<compile_context>
chip_gen: v7x
topology: tpu7x:2x2x1
jax: 0.10.0
libtpu: 0.0.40
codegen_flags: <defaults>
</compile_context>

<pallas_src>
import jax
import jax.numpy as jnp
from jax.experimental import pallas as pl
from jax.experimental.pallas import tpu as pltpu

EMB = 48       # embedding_dim
HID = 96       # hidden_size (PyTorch)
HID_P = 128    # hidden size padded to a full 128-lane vreg
VOCAB = 32     # synthetic vocab_size (len(c2ix))
V_P = 128      # vocab padded to 128 lanes for a lane-dense logits store


def lstm_kernel(xg_ref, w_hh_ref, h0_ref, c0_ref, w_out_ref, b_out_ref,
                logits_ref, hN_ref, cN_ref):
    """Full-sequence LSTM recurrence + fused output projection.

    xg_ref:     (T, B, 4*HID_P) f32  precomputed emb(x) @ W_ih^T + b  [i,f,o,g]
    w_hh_ref:   (HID_P, 4*HID_P) bf16 recurrent weights (reordered, padded)
    w_out_ref:  (HID_P, V_P) f32     output projection (padded)
    logits_ref: (B*T, V_P) f32       rows already in PyTorch (b, t) order
    """
    T, B, _ = xg_ref.shape
    w_hh = w_hh_ref[...]                       # (128, 512) bf16, VMEM-resident

    h = h0_ref[...]                            # (B, HID_P) f32, vreg-carried
    c = c0_ref[...]
    h_list = []

    # Fully-unrolled recurrence; only h @ W_hh is sequential.
    for t in range(T):
        gates = xg_ref[t] + jnp.dot(h.astype(jnp.bfloat16), w_hh,
                                    preferred_element_type=jnp.float32)
        # Gate layout [i | f | o | g]; sigmoid(x) = 0.5*tanh(0.5x)+0.5 keeps
        # the serial chain to one EUP op per gate slab (no exp + divide).
        ifo = 0.5 * jnp.tanh(0.5 * gates[:, :3 * HID_P]) + 0.5
        i_g = ifo[:, 0 * HID_P:1 * HID_P]
        f_g = ifo[:, 1 * HID_P:2 * HID_P]
        o_g = ifo[:, 2 * HID_P:3 * HID_P]
        g_g = jnp.tanh(gates[:, 3 * HID_P:4 * HID_P])

        c = f_g * c + i_g * g_g                # padded lanes stay exactly 0
        h = o_g * jnp.tanh(c)
        h_list.append(h)

    # Epilogue (off the critical path): assemble the h history directly in
    # PyTorch batch_first (b, t) row order and project once, lane-dense.
    rows = []
    for b in range(B):
        for t in range(T):
            rows.append(h_list[t][b:b + 1, :])
    h_flat = jnp.concatenate(rows, axis=0)     # (B*T, HID_P)

    logits_ref[...] = (jnp.dot(h_flat, w_out_ref[...],
                               preferred_element_type=jnp.float32)
                       + b_out_ref[...])
    hN_ref[...] = h
    cN_ref[...] = c


def prepare_params(emb_table, w_ih, w_hh, b_ih, b_hh, w_out, b_out):
    """One-time parameter repack (call once; not part of the forward)."""
    # torch gate order [i, f, g, o] -> [i, f, o, g], each padded 96 -> 128.
    def reorder_pad_rows(w):                           # (4*HID, D) -> (4*HID_P, D)
        i_, f_, g_, o_ = jnp.split(w, 4, axis=0)
        pad = lambda m: jnp.pad(m, ((0, HID_P - HID), (0, 0)))
        return jnp.concatenate([pad(i_), pad(f_), pad(o_), pad(g_)], axis=0)

    w_ih_rp = reorder_pad_rows(w_ih)                   # (4*HID_P, EMB)
    w_hh_rp = reorder_pad_rows(w_hh)                   # (4*HID_P, HID)
    w_hh_rp = jnp.pad(w_hh_rp, ((0, 0), (0, HID_P - HID)))
    w_hh_t = w_hh_rp.T.astype(jnp.bfloat16)            # (HID_P, 4*HID_P) bf16

    b = b_ih + b_hh
    bi, bf_, bg, bo = jnp.split(b, 4)
    padb = lambda v: jnp.pad(v, (0, HID_P - HID))
    b_comb = jnp.concatenate([padb(bi), padb(bf_), padb(bo), padb(bg)])

    # Fused embedding + input projection: row v = emb[v] @ W_ih^T + b.
    gate_table = (emb_table @ w_ih_rp.T + b_comb).astype(jnp.float32)  # (VOCAB, 4*HID_P)

    w_out_p = jnp.pad(w_out, ((0, V_P - VOCAB), (0, HID_P - HID)))     # (V_P, HID_P)
    w_out_t = w_out_p.T.astype(jnp.float32)                            # (HID_P, V_P)
    b_out_p = jnp.pad(b_out, (0, V_P - VOCAB)).reshape(1, V_P).astype(jnp.float32)
    return gate_table, w_hh_t, w_out_t, b_out_p


@jax.jit
def char_lstm_forward(tokens, params, states):
    """Pallas equivalent of CharacterLSTM.forward(x, states)."""
    gate_table, w_hh_t, w_out_t, b_out_p = params
    B, T = tokens.shape
    h0 = states[0][0]                                  # (B, HID)
    c0 = states[1][0]
    h0_p = jnp.pad(h0, ((0, 0), (0, HID_P - HID)))
    c0_p = jnp.pad(c0, ((0, 0), (0, HID_P - HID)))

    # Whole input projection per call = one fused gather (time-major layout).
    x_gates = gate_table[tokens.T]                     # (T, B, 4*HID_P) f32

    logits_pad, hN_p, cN_p = pl.pallas_call(
        lstm_kernel,
        out_shape=(
            jax.ShapeDtypeStruct((B * T, V_P), jnp.float32),   # logits, (b,t) order
            jax.ShapeDtypeStruct((B, HID_P), jnp.float32),     # h_N (padded)
            jax.ShapeDtypeStruct((B, HID_P), jnp.float32),     # c_N (padded)
        ),
        grid=(1,),
        in_specs=[
            pl.BlockSpec((T, B, 4 * HID_P), lambda i: (0, 0, 0)),   # X_gates
            pl.BlockSpec((HID_P, 4 * HID_P), lambda i: (0, 0)),     # W_hh^T (bf16)
            pl.BlockSpec((B, HID_P), lambda i: (0, 0)),             # h0
            pl.BlockSpec((B, HID_P), lambda i: (0, 0)),             # c0
            pl.BlockSpec((HID_P, V_P), lambda i: (0, 0)),           # W_out^T
            pl.BlockSpec((1, V_P), lambda i: (0, 0)),               # b_out
        ],
        out_specs=(
            pl.BlockSpec((B * T, V_P), lambda i: (0, 0)),
            pl.BlockSpec((B, HID_P), lambda i: (0, 0)),
            pl.BlockSpec((B, HID_P), lambda i: (0, 0)),
        ),
        compiler_params=pltpu.CompilerParams(
            dimension_semantics=("arbitrary",)),       # single sequential step
    )(x_gates, w_hh_t, h0_p, c0_p, w_out_t, b_out_p)

    # Rows already in PyTorch (b, t) order; only slice off padding.
    logits = logits_pad[:, :VOCAB]
    hN = hN_p[:, :HID]
    cN = cN_p[:, :HID]
    return logits, (hN[None], cN[None])                # states shaped (1, B, HID)


def reference_forward(tokens, emb_table, w_ih, w_hh, b_ih, b_hh,
                      w_out, b_out, states):
    """Pure-JAX reference matching torch.nn.LSTM semantics."""
    h0, c0 = states[0][0], states[1][0]
    x = emb_table[tokens]                              # (B, T, EMB)

    def step(carry, x_t):
        h, c = carry
        gates = x_t @ w_ih.T + b_ih + h @ w_hh.T + b_hh
        i, f, g, o = jnp.split(gates, 4, axis=-1)
        i, f, o = jax.nn.sigmoid(i), jax.nn.sigmoid(f), jax.nn.sigmoid(o)
        g = jnp.tanh(g)
        c = f * c + i * g
        h = o * jnp.tanh(c)
        return (h, c), h

    (hN, cN), hs = jax.lax.scan(step, (h0, c0), jnp.transpose(x, (1, 0, 2)))
    out = jnp.transpose(hs, (1, 0, 2)) @ w_out.T + b_out
    return out.reshape(-1, VOCAB), (hN[None], cN[None])


if __name__ == "__main__":
    B, T = 2, 8
    key = jax.random.PRNGKey(0)
    k_tok, k_emb, k_ih, k_hh, k_bih, k_bhh, k_wo, k_bo = jax.random.split(key, 8)

    tokens = jax.random.randint(k_tok, (B, T), 0, VOCAB, dtype=jnp.int32)
    emb_table = jax.random.normal(k_emb, (VOCAB, EMB), jnp.float32) * 0.1
    w_ih = jax.random.normal(k_ih, (4 * HID, EMB), jnp.float32) * 0.1
    w_hh = jax.random.normal(k_hh, (4 * HID, HID), jnp.float32) * 0.1
    b_ih = jax.random.normal(k_bih, (4 * HID,), jnp.float32) * 0.1
    b_hh = jax.random.normal(k_bhh, (4 * HID,), jnp.float32) * 0.1
    w_out = jax.random.normal(k_wo, (VOCAB, HID), jnp.float32) * 0.1
    b_out = jax.random.normal(k_bo, (VOCAB,), jnp.float32) * 0.1

    # __init_state__(batch_size): zero hidden / cell of shape (1, B, HID).
    states = (jnp.zeros((1, B, HID), jnp.float32),
              jnp.zeros((1, B, HID), jnp.float32))

    # One-time parameter repack (outside the jitted forward).
    params = prepare_params(emb_table, w_ih, w_hh, b_ih, b_hh, w_out, b_out)

    logits, (hN, cN) = char_lstm_forward(tokens, params, states)
    jax.block_until_ready((logits, hN, cN))

    ref_logits, (ref_hN, ref_cN) = reference_forward(
        tokens, emb_table, w_ih, w_hh, b_ih, b_hh, w_out, b_out, states)

    assert logits.shape == (B * T, VOCAB)
    assert hN.shape == (1, B, HID) and cN.shape == (1, B, HID)
    # Tolerance sized for the single-pass bf16 recurrent matmul (error ~1e-3
    # at these weight scales); f32 epilogue keeps logits well inside this.
    assert jnp.max(jnp.abs(logits - ref_logits)) < 1e-2
    assert jnp.max(jnp.abs(hN - ref_hN)) < 1e-2
    assert jnp.max(jnp.abs(cN - ref_cN)) < 1e-2

    print("KERNEL_OK")
</pallas_src>

<mosaic_0001>
module attributes {stable_mosaic.version = 11 : i64} {
  func.func @lstm_kernel(%arg0: i32, %arg1: memref<8x2x512xf32, #tpu.memory_space<vmem>>, %arg2: memref<128x512xbf16, #tpu.memory_space<vmem>>, %arg3: memref<2x128xf32, #tpu.memory_space<vmem>>, %arg4: memref<2x128xf32, #tpu.memory_space<vmem>>, %arg5: memref<128x128xf32, #tpu.memory_space<vmem>>, %arg6: memref<1x128xf32, #tpu.memory_space<vmem>>, %arg7: memref<16x128xf32, #tpu.memory_space<vmem>>, %arg8: memref<2x128xf32, #tpu.memory_space<vmem>>, %arg9: memref<2x128xf32, #tpu.memory_space<vmem>>) attributes {dimension_semantics = [#tpu.dimension_semantics<arbitrary>], iteration_bounds = array<i64: 1>, scalar_prefetch = 0 : i64, scratch_operands = 0 : i64, tpu.core_type = #tpu.core_type<tc>, window_params = [{pipeline_mode = #tpu.pipeline_mode<synchronous>, transform_indices = @transform_0, window_bounds = array<i64: 8, 2, 512>}, {pipeline_mode = #tpu.pipeline_mode<synchronous>, transform_indices = @transform_1, window_bounds = array<i64: 128, 512>}, {pipeline_mode = #tpu.pipeline_mode<synchronous>, transform_indices = @transform_2, window_bounds = array<i64: 2, 128>}, {pipeline_mode = #tpu.pipeline_mode<synchronous>, transform_indices = @transform_3, window_bounds = array<i64: 2, 128>}, {pipeline_mode = #tpu.pipeline_mode<synchronous>, transform_indices = @transform_4, window_bounds = array<i64: 128, 128>}, {pipeline_mode = #tpu.pipeline_mode<synchronous>, transform_indices = @transform_5, window_bounds = array<i64: 1, 128>}, {pipeline_mode = #tpu.pipeline_mode<synchronous>, transform_indices = @transform_6, window_bounds = array<i64: 16, 128>}, {pipeline_mode = #tpu.pipeline_mode<synchronous>, transform_indices = @transform_7, window_bounds = array<i64: 2, 128>}, {pipeline_mode = #tpu.pipeline_mode<synchronous>, transform_indices = @transform_8, window_bounds = array<i64: 2, 128>}]} {
    %c0 = arith.constant 0 : index
    %c0_0 = arith.constant 0 : index
    %0 = vector.load %arg2[%c0, %c0_0] : memref<128x512xbf16, #tpu.memory_space<vmem>>, vector<128x512xbf16>
    %c0_1 = arith.constant 0 : index
    %c0_2 = arith.constant 0 : index
    %1 = vector.load %arg3[%c0_1, %c0_2] : memref<2x128xf32, #tpu.memory_space<vmem>>, vector<2x128xf32>
    %c0_3 = arith.constant 0 : index
    %c0_4 = arith.constant 0 : index
    %2 = vector.load %arg4[%c0_3, %c0_4] : memref<2x128xf32, #tpu.memory_space<vmem>>, vector<2x128xf32>
    %c0_5 = arith.constant 0 : index
    %c0_6 = arith.constant 0 : index
    %c0_7 = arith.constant 0 : index
    %3 = vector.load %arg1[%c0_5, %c0_6, %c0_7] : memref<8x2x512xf32, #tpu.memory_space<vmem>>, vector<1x2x512xf32>
    %4 = vector.shape_cast %3 : vector<1x2x512xf32> to vector<2x512xf32>
    %5 = arith.truncf %1 : vector<2x128xf32> to vector<2x128xbf16>
    %cst = arith.constant dense<0.000000e+00> : vector<2x512xf32>
    %6 = tpu.matmul %5, %0, %cst {dimension_numbers = #tpu.dot_dimension_numbers<[1], [0], [0], [1], [0, 0, 1, 1], [], []>} : vector<2x128xbf16>, vector<128x512xbf16>, vector<2x512xf32> -> vector<2x512xf32>
    %7 = arith.addf %4, %6 : vector<2x512xf32>
    %8 = vector.extract_strided_slice %7 {offsets = [0, 0], sizes = [2, 384], strides = [1, 1]} : vector<2x512xf32> to vector<2x384xf32>
    %cst_8 = arith.constant 5.000000e-01 : f32
    %9 = vector.broadcast %cst_8 : f32 to vector<2x384xf32>
    %10 = arith.mulf %9, %8 : vector<2x384xf32>
    %11 = math.tanh %10 : vector<2x384xf32>
    %cst_9 = arith.constant 5.000000e-01 : f32
    %12 = vector.broadcast %cst_9 : f32 to vector<2x384xf32>
    %13 = arith.mulf %12, %11 : vector<2x384xf32>
    %cst_10 = arith.constant 5.000000e-01 : f32
    %14 = vector.broadcast %cst_10 : f32 to vector<2x384xf32>
    %15 = arith.addf %13, %14 : vector<2x384xf32>
    %16 = vector.extract_strided_slice %15 {offsets = [0, 0], sizes = [2, 128], strides = [1, 1]} : vector<2x384xf32> to vector<2x128xf32>
    %17 = vector.extract_strided_slice %15 {offsets = [0, 128], sizes = [2, 128], strides = [1, 1]} : vector<2x384xf32> to vector<2x128xf32>
    %18 = vector.extract_strided_slice %15 {offsets = [0, 256], sizes = [2, 128], strides = [1, 1]} : vector<2x384xf32> to vector<2x128xf32>
    %19 = vector.extract_strided_slice %7 {offsets = [0, 384], sizes = [2, 128], strides = [1, 1]} : vector<2x512xf32> to vector<2x128xf32>
    %20 = math.tanh %19 : vector<2x128xf32>
    %21 = arith.mulf %17, %2 : vector<2x128xf32>
    %22 = arith.mulf %16, %20 : vector<2x128xf32>
    %23 = arith.addf %21, %22 : vector<2x128xf32>
    %24 = math.tanh %23 : vector<2x128xf32>
    %25 = arith.mulf %18, %24 : vector<2x128xf32>
    %c1 = arith.constant 1 : index
    %c0_11 = arith.constant 0 : index
    %c0_12 = arith.constant 0 : index
    %26 = vector.load %arg1[%c1, %c0_11, %c0_12] : memref<8x2x512xf32, #tpu.memory_space<vmem>>, vector<1x2x512xf32>
    %27 = vector.shape_cast %26 : vector<1x2x512xf32> to vector<2x512xf32>
    %28 = arith.truncf %25 : vector<2x128xf32> to vector<2x128xbf16>
    %cst_13 = arith.constant dense<0.000000e+00> : vector<2x512xf32>
    %29 = tpu.matmul %28, %0, %cst_13 {dimension_numbers = #tpu.dot_dimension_numbers<[1], [0], [0], [1], [0, 0, 1, 1], [], []>} : vector<2x128xbf16>, vector<128x512xbf16>, vector<2x512xf32> -> vector<2x512xf32>
    %30 = arith.addf %27, %29 : vector<2x512xf32>
    %31 = vector.extract_strided_slice %30 {offsets = [0, 0], sizes = [2, 384], strides = [1, 1]} : vector<2x512xf32> to vector<2x384xf32>
    %cst_14 = arith.constant 5.000000e-01 : f32
    %32 = vector.broadcast %cst_14 : f32 to vector<2x384xf32>
    %33 = arith.mulf %32, %31 : vector<2x384xf32>
    %34 = math.tanh %33 : vector<2x384xf32>
    %cst_15 = arith.constant 5.000000e-01 : f32
    %35 = vector.broadcast %cst_15 : f32 to vector<2x384xf32>
    %36 = arith.mulf %35, %34 : vector<2x384xf32>
    %cst_16 = arith.constant 5.000000e-01 : f32
    %37 = vector.broadcast %cst_16 : f32 to vector<2x384xf32>
    %38 = arith.addf %36, %37 : vector<2x384xf32>
    %39 = vector.extract_strided_slice %38 {offsets = [0, 0], sizes = [2, 128], strides = [1, 1]} : vector<2x384xf32> to vector<2x128xf32>
    %40 = vector.extract_strided_slice %38 {offsets = [0, 128], sizes = [2, 128], strides = [1, 1]} : vector<2x384xf32> to vector<2x128xf32>
    %41 = vector.extract_strided_slice %38 {offsets = [0, 256], sizes = [2, 128], strides = [1, 1]} : vector<2x384xf32> to vector<2x128xf32>
    %42 = vector.extract_strided_slice %30 {offsets = [0, 384], sizes = [2, 128], strides = [1, 1]} : vector<2x512xf32> to vector<2x128xf32>
    %43 = math.tanh %42 : vector<2x128xf32>
    %44 = arith.mulf %40, %23 : vector<2x128xf32>
    %45 = arith.mulf %39, %43 : vector<2x128xf32>
    %46 = arith.addf %44, %45 : vector<2x128xf32>
    %47 = math.tanh %46 : vector<2x128xf32>
    %48 = arith.mulf %41, %47 : vector<2x128xf32>
    %c2 = arith.constant 2 : index
    %c0_17 = arith.constant 0 : index
    %c0_18 = arith.constant 0 : index
    %49 = vector.load %arg1[%c2, %c0_17, %c0_18] : memref<8x2x512xf32, #tpu.memory_space<vmem>>, vector<1x2x512xf32>
    %50 = vector.shape_cast %49 : vector<1x2x512xf32> to vector<2x512xf32>
    %51 = arith.truncf %48 : vector<2x128xf32> to vector<2x128xbf16>
    %cst_19 = arith.constant dense<0.000000e+00> : vector<2x512xf32>
    %52 = tpu.matmul %51, %0, %cst_19 {dimension_numbers = #tpu.dot_dimension_numbers<[1], [0], [0], [1], [0, 0, 1, 1], [], []>} : vector<2x128xbf16>, vector<128x512xbf16>, vector<2x512xf32> -> vector<2x512xf32>
    %53 = arith.addf %50, %52 : vector<2x512xf32>
    %54 = vector.extract_strided_slice %53 {offsets = [0, 0], sizes = [2, 384], strides = [1, 1]} : vector<2x512xf32> to vector<2x384xf32>
    %cst_20 = arith.constant 5.000000e-01 : f32
    %55 = vector.broadcast %cst_20 : f32 to vector<2x384xf32>
    %56 = arith.mulf %55, %54 : vector<2x384xf32>
    %57 = math.tanh %56 : vector<2x384xf32>
    %cst_21 = arith.constant 5.000000e-01 : f32
    %58 = vector.broadcast %cst_21 : f32 to vector<2x384xf32>
    %59 = arith.mulf %58, %57 : vector<2x384xf32>
    %cst_22 = arith.constant 5.000000e-01 : f32
    %60 = vector.broadcast %cst_22 : f32 to vector<2x384xf32>
    %61 = arith.addf %59, %60 : vector<2x384xf32>
    %62 = vector.extract_strided_slice %61 {offsets = [0, 0], sizes = [2, 128], strides = [1, 1]} : vector<2x384xf32> to vector<2x128xf32>
    %63 = vector.extract_strided_slice %61 {offsets = [0, 128], sizes = [2, 128], strides = [1, 1]} : vector<2x384xf32> to vector<2x128xf32>
    %64 = vector.extract_strided_slice %61 {offsets = [0, 256], sizes = [2, 128], strides = [1, 1]} : vector<2x384xf32> to vector<2x128xf32>
    %65 = vector.extract_strided_slice %53 {offsets = [0, 384], sizes = [2, 128], strides = [1, 1]} : vector<2x512xf32> to vector<2x128xf32>
    %66 = math.tanh %65 : vector<2x128xf32>
    %67 = arith.mulf %63, %46 : vector<2x128xf32>
    %68 = arith.mulf %62, %66 : vector<2x128xf32>
    %69 = arith.addf %67, %68 : vector<2x128xf32>
    %70 = math.tanh %69 : vector<2x128xf32>
    %71 = arith.mulf %64, %70 : vector<2x128xf32>
    %c3 = arith.constant 3 : index
    %c0_23 = arith.constant 0 : index
    %c0_24 = arith.constant 0 : index
    %72 = vector.load %arg1[%c3, %c0_23, %c0_24] : memref<8x2x512xf32, #tpu.memory_space<vmem>>, vector<1x2x512xf32>
    %73 = vector.shape_cast %72 : vector<1x2x512xf32> to vector<2x512xf32>
    %74 = arith.truncf %71 : vector<2x128xf32> to vector<2x128xbf16>
    %cst_25 = arith.constant dense<0.000000e+00> : vector<2x512xf32>
    %75 = tpu.matmul %74, %0, %cst_25 {dimension_numbers = #tpu.dot_dimension_numbers<[1], [0], [0], [1], [0, 0, 1, 1], [], []>} : vector<2x128xbf16>, vector<128x512xbf16>, vector<2x512xf32> -> vector<2x512xf32>
    %76 = arith.addf %73, %75 : vector<2x512xf32>
    %77 = vector.extract_strided_slice %76 {offsets = [0, 0], sizes = [2, 384], strides = [1, 1]} : vector<2x512xf32> to vector<2x384xf32>
    %cst_26 = arith.constant 5.000000e-01 : f32
    %78 = vector.broadcast %cst_26 : f32 to vector<2x384xf32>
    %79 = arith.mulf %78, %77 : vector<2x384xf32>
    %80 = math.tanh %79 : vector<2x384xf32>
    %cst_27 = arith.constant 5.000000e-01 : f32
    %81 = vector.broadcast %cst_27 : f32 to vector<2x384xf32>
    %82 = arith.mulf %81, %80 : vector<2x384xf32>
    %cst_28 = arith.constant 5.000000e-01 : f32
    %83 = vector.broadcast %cst_28 : f32 to vector<2x384xf32>
    %84 = arith.addf %82, %83 : vector<2x384xf32>
    %85 = vector.extract_strided_slice %84 {offsets = [0, 0], sizes = [2, 128], strides = [1, 1]} : vector<2x384xf32> to vector<2x128xf32>
    %86 = vector.extract_strided_slice %84 {offsets = [0, 128], sizes = [2, 128], strides = [1, 1]} : vector<2x384xf32> to vector<2x128xf32>
    %87 = vector.extract_strided_slice %84 {offsets = [0, 256], sizes = [2, 128], strides = [1, 1]} : vector<2x384xf32> to vector<2x128xf32>
    %88 = vector.extract_strided_slice %76 {offsets = [0, 384], sizes = [2, 128], strides = [1, 1]} : vector<2x512xf32> to vector<2x128xf32>
    %89 = math.tanh %88 : vector<2x128xf32>
    %90 = arith.mulf %86, %69 : vector<2x128xf32>
    %91 = arith.mulf %85, %89 : vector<2x128xf32>
    %92 = arith.addf %90, %91 : vector<2x128xf32>
    %93 = math.tanh %92 : vector<2x128xf32>
    %94 = arith.mulf %87, %93 : vector<2x128xf32>
    %c4 = arith.constant 4 : index
    %c0_29 = arith.constant 0 : index
    %c0_30 = arith.constant 0 : index
    %95 = vector.load %arg1[%c4, %c0_29, %c0_30] : memref<8x2x512xf32, #tpu.memory_space<vmem>>, vector<1x2x512xf32>
    %96 = vector.shape_cast %95 : vector<1x2x512xf32> to vector<2x512xf32>
    %97 = arith.truncf %94 : vector<2x128xf32> to vector<2x128xbf16>
    %cst_31 = arith.constant dense<0.000000e+00> : vector<2x512xf32>
    %98 = tpu.matmul %97, %0, %cst_31 {dimension_numbers = #tpu.dot_dimension_numbers<[1], [0], [0], [1], [0, 0, 1, 1], [], []>} : vector<2x128xbf16>, vector<128x512xbf16>, vector<2x512xf32> -> vector<2x512xf32>
    %99 = arith.addf %96, %98 : vector<2x512xf32>
    %100 = vector.extract_strided_slice %99 {offsets = [0, 0], sizes = [2, 384], strides = [1, 1]} : vector<2x512xf32> to vector<2x384xf32>
    %cst_32 = arith.constant 5.000000e-01 : f32
    %101 = vector.broadcast %cst_32 : f32 to vector<2x384xf32>
    %102 = arith.mulf %101, %100 : vector<2x384xf32>
    %103 = math.tanh %102 : vector<2x384xf32>
    %cst_33 = arith.constant 5.000000e-01 : f32
    %104 = vector.broadcast %cst_33 : f32 to vector<2x384xf32>
    %105 = arith.mulf %104, %103 : vector<2x384xf32>
    %cst_34 = arith.constant 5.000000e-01 : f32
    %106 = vector.broadcast %cst_34 : f32 to vector<2x384xf32>
    %107 = arith.addf %105, %106 : vector<2x384xf32>
    %108 = vector.extract_strided_slice %107 {offsets = [0, 0], sizes = [2, 128], strides = [1, 1]} : vector<2x384xf32> to vector<2x128xf32>
    %109 = vector.extract_strided_slice %107 {offsets = [0, 128], sizes = [2, 128], strides = [1, 1]} : vector<2x384xf32> to vector<2x128xf32>
    %110 = vector.extract_strided_slice %107 {offsets = [0, 256], sizes = [2, 128], strides = [1, 1]} : vector<2x384xf32> to vector<2x128xf32>
    %111 = vector.extract_strided_slice %99 {offsets = [0, 384], sizes = [2, 128], strides = [1, 1]} : vector<2x512xf32> to vector<2x128xf32>
    %112 = math.tanh %111 : vector<2x128xf32>
    %113 = arith.mulf %109, %92 : vector<2x128xf32>
    %114 = arith.mulf %108, %112 : vector<2x128xf32>
    %115 = arith.addf %113, %114 : vector<2x128xf32>
    %116 = math.tanh %115 : vector<2x128xf32>
    %117 = arith.mulf %110, %116 : vector<2x128xf32>
    %c5 = arith.constant 5 : index
    %c0_35 = arith.constant 0 : index
    %c0_36 = arith.constant 0 : index
    %118 = vector.load %arg1[%c5, %c0_35, %c0_36] : memref<8x2x512xf32, #tpu.memory_space<vmem>>, vector<1x2x512xf32>
    %119 = vector.shape_cast %118 : vector<1x2x512xf32> to vector<2x512xf32>
    %120 = arith.truncf %117 : vector<2x128xf32> to vector<2x128xbf16>
    %cst_37 = arith.constant dense<0.000000e+00> : vector<2x512xf32>
    %121 = tpu.matmul %120, %0, %cst_37 {dimension_numbers = #tpu.dot_dimension_numbers<[1], [0], [0], [1], [0, 0, 1, 1], [], []>} : vector<2x128xbf16>, vector<128x512xbf16>, vector<2x512xf32> -> vector<2x512xf32>
    %122 = arith.addf %119, %121 : vector<2x512xf32>
    %123 = vector.extract_strided_slice %122 {offsets = [0, 0], sizes = [2, 384], strides = [1, 1]} : vector<2x512xf32> to vector<2x384xf32>
    %cst_38 = arith.constant 5.000000e-01 : f32
    %124 = vector.broadcast %cst_38 : f32 to vector<2x384xf32>
    %125 = arith.mulf %124, %123 : vector<2x384xf32>
    %126 = math.tanh %125 : vector<2x384xf32>
    %cst_39 = arith.constant 5.000000e-01 : f32
    %127 = vector.broadcast %cst_39 : f32 to vector<2x384xf32>
    %128 = arith.mulf %127, %126 : vector<2x384xf32>
    %cst_40 = arith.constant 5.000000e-01 : f32
    %129 = vector.broadcast %cst_40 : f32 to vector<2x384xf32>
    %130 = arith.addf %128, %129 : vector<2x384xf32>
    %131 = vector.extract_strided_slice %130 {offsets = [0, 0], sizes = [2, 128], strides = [1, 1]} : vector<2x384xf32> to vector<2x128xf32>
    %132 = vector.extract_strided_slice %130 {offsets = [0, 128], sizes = [2, 128], strides = [1, 1]} : vector<2x384xf32> to vector<2x128xf32>
    %133 = vector.extract_strided_slice %130 {offsets = [0, 256], sizes = [2, 128], strides = [1, 1]} : vector<2x384xf32> to vector<2x128xf32>
    %134 = vector.extract_strided_slice %122 {offsets = [0, 384], sizes = [2, 128], strides = [1, 1]} : vector<2x512xf32> to vector<2x128xf32>
    %135 = math.tanh %134 : vector<2x128xf32>
    %136 = arith.mulf %132, %115 : vector<2x128xf32>
    %137 = arith.mulf %131, %135 : vector<2x128xf32>
    %138 = arith.addf %136, %137 : vector<2x128xf32>
    %139 = math.tanh %138 : vector<2x128xf32>
    %140 = arith.mulf %133, %139 : vector<2x128xf32>
    %c6 = arith.constant 6 : index
    %c0_41 = arith.constant 0 : index
    %c0_42 = arith.constant 0 : index
    %141 = vector.load %arg1[%c6, %c0_41, %c0_42] : memref<8x2x512xf32, #tpu.memory_space<vmem>>, vector<1x2x512xf32>
    %142 = vector.shape_cast %141 : vector<1x2x512xf32> to vector<2x512xf32>
    %143 = arith.truncf %140 : vector<2x128xf32> to vector<2x128xbf16>
    %cst_43 = arith.constant dense<0.000000e+00> : vector<2x512xf32>
    %144 = tpu.matmul %143, %0, %cst_43 {dimension_numbers = #tpu.dot_dimension_numbers<[1], [0], [0], [1], [0, 0, 1, 1], [], []>} : vector<2x128xbf16>, vector<128x512xbf16>, vector<2x512xf32> -> vector<2x512xf32>
    %145 = arith.addf %142, %144 : vector<2x512xf32>
    %146 = vector.extract_strided_slice %145 {offsets = [0, 0], sizes = [2, 384], strides = [1, 1]} : vector<2x512xf32> to vector<2x384xf32>
    %cst_44 = arith.constant 5.000000e-01 : f32
    %147 = vector.broadcast %cst_44 : f32 to vector<2x384xf32>
    %148 = arith.mulf %147, %146 : vector<2x384xf32>
    %149 = math.tanh %148 : vector<2x384xf32>
    %cst_45 = arith.constant 5.000000e-01 : f32
    %150 = vector.broadcast %cst_45 : f32 to vector<2x384xf32>
    %151 = arith.mulf %150, %149 : vector<2x384xf32>
    %cst_46 = arith.constant 5.000000e-01 : f32
    %152 = vector.broadcast %cst_46 : f32 to vector<2x384xf32>
    %153 = arith.addf %151, %152 : vector<2x384xf32>
    %154 = vector.extract_strided_slice %153 {offsets = [0, 0], sizes = [2, 128], strides = [1, 1]} : vector<2x384xf32> to vector<2x128xf32>
    %155 = vector.extract_strided_slice %153 {offsets = [0, 128], sizes = [2, 128], strides = [1, 1]} : vector<2x384xf32> to vector<2x128xf32>
    %156 = vector.extract_strided_slice %153 {offsets = [0, 256], sizes = [2, 128], strides = [1, 1]} : vector<2x384xf32> to vector<2x128xf32>
    %157 = vector.extract_strided_slice %145 {offsets = [0, 384], sizes = [2, 128], strides = [1, 1]} : vector<2x512xf32> to vector<2x128xf32>
    %158 = math.tanh %157 : vector<2x128xf32>
    %159 = arith.mulf %155, %138 : vector<2x128xf32>
    %160 = arith.mulf %154, %158 : vector<2x128xf32>
    %161 = arith.addf %159, %160 : vector<2x128xf32>
    %162 = math.tanh %161 : vector<2x128xf32>
    %163 = arith.mulf %156, %162 : vector<2x128xf32>
    %c7 = arith.constant 7 : index
    %c0_47 = arith.constant 0 : index
    %c0_48 = arith.constant 0 : index
    %164 = vector.load %arg1[%c7, %c0_47, %c0_48] : memref<8x2x512xf32, #tpu.memory_space<vmem>>, vector<1x2x512xf32>
    %165 = vector.shape_cast %164 : vector<1x2x512xf32> to vector<2x512xf32>
    %166 = arith.truncf %163 : vector<2x128xf32> to vector<2x128xbf16>
    %cst_49 = arith.constant dense<0.000000e+00> : vector<2x512xf32>
    %167 = tpu.matmul %166, %0, %cst_49 {dimension_numbers = #tpu.dot_dimension_numbers<[1], [0], [0], [1], [0, 0, 1, 1], [], []>} : vector<2x128xbf16>, vector<128x512xbf16>, vector<2x512xf32> -> vector<2x512xf32>
    %168 = arith.addf %165, %167 : vector<2x512xf32>
    %169 = vector.extract_strided_slice %168 {offsets = [0, 0], sizes = [2, 384], strides = [1, 1]} : vector<2x512xf32> to vector<2x384xf32>
    %cst_50 = arith.constant 5.000000e-01 : f32
    %170 = vector.broadcast %cst_50 : f32 to vector<2x384xf32>
    %171 = arith.mulf %170, %169 : vector<2x384xf32>
    %172 = math.tanh %171 : vector<2x384xf32>
    %cst_51 = arith.constant 5.000000e-01 : f32
    %173 = vector.broadcast %cst_51 : f32 to vector<2x384xf32>
    %174 = arith.mulf %173, %172 : vector<2x384xf32>
    %cst_52 = arith.constant 5.000000e-01 : f32
    %175 = vector.broadcast %cst_52 : f32 to vector<2x384xf32>
    %176 = arith.addf %174, %175 : vector<2x384xf32>
    %177 = vector.extract_strided_slice %176 {offsets = [0, 0], sizes = [2, 128], strides = [1, 1]} : vector<2x384xf32> to vector<2x128xf32>
    %178 = vector.extract_strided_slice %176 {offsets = [0, 128], sizes = [2, 128], strides = [1, 1]} : vector<2x384xf32> to vector<2x128xf32>
    %179 = vector.extract_strided_slice %176 {offsets = [0, 256], sizes = [2, 128], strides = [1, 1]} : vector<2x384xf32> to vector<2x128xf32>
    %180 = vector.extract_strided_slice %168 {offsets = [0, 384], sizes = [2, 128], strides = [1, 1]} : vector<2x512xf32> to vector<2x128xf32>
    %181 = math.tanh %180 : vector<2x128xf32>
    %182 = arith.mulf %178, %161 : vector<2x128xf32>
    %183 = arith.mulf %177, %181 : vector<2x128xf32>
    %184 = arith.addf %182, %183 : vector<2x128xf32>
    %185 = math.tanh %184 : vector<2x128xf32>
    %186 = arith.mulf %179, %185 : vector<2x128xf32>
    %187 = vector.extract_strided_slice %25 {offsets = [0, 0], sizes = [1, 128], strides = [1, 1]} : vector<2x128xf32> to vector<1x128xf32>
    %188 = vector.extract_strided_slice %48 {offsets = [0, 0], sizes = [1, 128], strides = [1, 1]} : vector<2x128xf32> to vector<1x128xf32>
    %189 = vector.extract_strided_slice %71 {offsets = [0, 0], sizes = [1, 128], strides = [1, 1]} : vector<2x128xf32> to vector<1x128xf32>
    %190 = vector.extract_strided_slice %94 {offsets = [0, 0], sizes = [1, 128], strides = [1, 1]} : vector<2x128xf32> to vector<1x128xf32>
    %191 = vector.extract_strided_slice %117 {offsets = [0, 0], sizes = [1, 128], strides = [1, 1]} : vector<2x128xf32> to vector<1x128xf32>
    %192 = vector.extract_strided_slice %140 {offsets = [0, 0], sizes = [1, 128], strides = [1, 1]} : vector<2x128xf32> to vector<1x128xf32>
    %193 = vector.extract_strided_slice %163 {offsets = [0, 0], sizes = [1, 128], strides = [1, 1]} : vector<2x128xf32> to vector<1x128xf32>
    %194 = vector.extract_strided_slice %186 {offsets = [0, 0], sizes = [1, 128], strides = [1, 1]} : vector<2x128xf32> to vector<1x128xf32>
    %195 = vector.extract_strided_slice %25 {offsets = [1, 0], sizes = [1, 128], strides = [1, 1]} : vector<2x128xf32> to vector<1x128xf32>
    %196 = vector.extract_strided_slice %48 {offsets = [1, 0], sizes = [1, 128], strides = [1, 1]} : vector<2x128xf32> to vector<1x128xf32>
    %197 = vector.extract_strided_slice %71 {offsets = [1, 0], sizes = [1, 128], strides = [1, 1]} : vector<2x128xf32> to vector<1x128xf32>
    %198 = vector.extract_strided_slice %94 {offsets = [1, 0], sizes = [1, 128], strides = [1, 1]} : vector<2x128xf32> to vector<1x128xf32>
    %199 = vector.extract_strided_slice %117 {offsets = [1, 0], sizes = [1, 128], strides = [1, 1]} : vector<2x128xf32> to vector<1x128xf32>
    %200 = vector.extract_strided_slice %140 {offsets = [1, 0], sizes = [1, 128], strides = [1, 1]} : vector<2x128xf32> to vector<1x128xf32>
    %201 = vector.extract_strided_slice %163 {offsets = [1, 0], sizes = [1, 128], strides = [1, 1]} : vector<2x128xf32> to vector<1x128xf32>
    %202 = vector.extract_strided_slice %186 {offsets = [1, 0], sizes = [1, 128], strides = [1, 1]} : vector<2x128xf32> to vector<1x128xf32>
    %203 = tpu.concatenate %187, %188, %189, %190, %191, %192, %193, %194, %195, %196, %197, %198, %199, %200, %201, %202 in 0 : vector<1x128xf32>, vector<1x128xf32>, vector<1x128xf32>, vector<1x128xf32>, vector<1x128xf32>, vector<1x128xf32>, vector<1x128xf32>, vector<1x128xf32>, vector<1x128xf32>, vector<1x128xf32>, vector<1x128xf32>, vector<1x128xf32>, vector<1x128xf32>, vector<1x128xf32>, vector<1x128xf32>, vector<1x128xf32> -> vector<16x128xf32>
    %c0_53 = arith.constant 0 : index
    %c0_54 = arith.constant 0 : index
    %204 = vector.load %arg5[%c0_53, %c0_54] : memref<128x128xf32, #tpu.memory_space<vmem>>, vector<128x128xf32>
    %cst_55 = arith.constant dense<0.000000e+00> : vector<16x128xf32>
    %205 = tpu.matmul %203, %204, %cst_55 {dimension_numbers = #tpu.dot_dimension_numbers<[1], [0], [0], [1], [0, 0, 1, 1], [], []>} : vector<16x128xf32>, vector<128x128xf32>, vector<16x128xf32> -> vector<16x128xf32>
    %c0_56 = arith.constant 0 : index
    %c0_57 = arith.constant 0 : index
    %206 = vector.load %arg6[%c0_56, %c0_57] : memref<1x128xf32, #tpu.memory_space<vmem>>, vector<1x128xf32>
    %207 = vector.broadcast %206 : vector<1x128xf32> to vector<16x128xf32>
    %208 = arith.addf %205, %207 : vector<16x128xf32>
    %c0_58 = arith.constant 0 : index
    %c0_59 = arith.constant 0 : index
    %209 = vector.load %arg7[%c0_58, %c0_59] : memref<16x128xf32, #tpu.memory_space<vmem>>, vector<16x128xf32>
    tpu.vector_store %arg7[%c0_58, %c0_59], %208 {strides = array<i32>} : memref<16x128xf32, #tpu.memory_space<vmem>>, vector<16x128xf32>,
    %c0_60 = arith.constant 0 : index
    %c0_61 = arith.constant 0 : index
    %210 = vector.load %arg8[%c0_60, %c0_61] : memref<2x128xf32, #tpu.memory_space<vmem>>, vector<2x128xf32>
    tpu.vector_store %arg8[%c0_60, %c0_61], %186 {strides = array<i32>} : memref<2x128xf32, #tpu.memory_space<vmem>>, vector<2x128xf32>,
    %c0_62 = arith.constant 0 : index
    %c0_63 = arith.constant 0 : index
    %211 = vector.load %arg9[%c0_62, %c0_63] : memref<2x128xf32, #tpu.memory_space<vmem>>, vector<2x128xf32>
    tpu.vector_store %arg9[%c0_62, %c0_63], %184 {strides = array<i32>} : memref<2x128xf32, #tpu.memory_space<vmem>>, vector<2x128xf32>,
    return
  }
  func.func @transform_0(%arg0: i32) -> (i32, i32, i32) {
    %c0_i32 = arith.constant 0 : i32
    %c0_i32_0 = arith.constant 0 : i32
    %c0_i32_1 = arith.constant 0 : i32
    %c0_i32_2 = arith.constant 0 : i32
    return %c0_i32, %c0_i32_0, %c0_i32_1 : i32, i32, i32
  }
  func.func @transform_1(%arg0: i32) -> (i32, i32) {
    %c0_i32 = arith.constant 0 : i32
    %c0_i32_0 = arith.constant 0 : i32
    %c0_i32_1 = arith.constant 0 : i32
    return %c0_i32, %c0_i32_0 : i32, i32
  }
  func.func @transform_2(%arg0: i32) -> (i32, i32) {
    %c0_i32 = arith.constant 0 : i32
    %c0_i32_0 = arith.constant 0 : i32
    %c0_i32_1 = arith.constant 0 : i32
    return %c0_i32, %c0_i32_0 : i32, i32
  }
  func.func @transform_3(%arg0: i32) -> (i32, i32) {
    %c0_i32 = arith.constant 0 : i32
    %c0_i32_0 = arith.constant 0 : i32
    %c0_i32_1 = arith.constant 0 : i32
    return %c0_i32, %c0_i32_0 : i32, i32
  }
  func.func @transform_4(%arg0: i32) -> (i32, i32) {
    %c0_i32 = arith.constant 0 : i32
    %c0_i32_0 = arith.constant 0 : i32
    %c0_i32_1 = arith.constant 0 : i32
    return %c0_i32, %c0_i32_0 : i32, i32
  }
  func.func @transform_5(%arg0: i32) -> (i32, i32) {
    %c0_i32 = arith.constant 0 : i32
    %c0_i32_0 = arith.constant 0 : i32
    %c0_i32_1 = arith.constant 0 : i32
    return %c0_i32, %c0_i32_0 : i32, i32
  }
  func.func @transform_6(%arg0: i32) -> (i32, i32) {
    %c0_i32 = arith.constant 0 : i32
    %c0_i32_0 = arith.constant 0 : i32
    %c0_i32_1 = arith.constant 0 : i32
    return %c0_i32, %c0_i32_0 : i32, i32
  }
  func.func @transform_7(%arg0: i32) -> (i32, i32) {
    %c0_i32 = arith.constant 0 : i32
    %c0_i32_0 = arith.constant 0 : i32
    %c0_i32_1 = arith.constant 0 : i32
    return %c0_i32, %c0_i32_0 : i32, i32
  }
  func.func @transform_8(%arg0: i32) -> (i32, i32) {
    %c0_i32 = arith.constant 0 : i32
    %c0_i32_0 = arith.constant 0 : i32
    %c0_i32_1 = arith.constant 0 : i32
    return %c0_i32, %c0_i32_0 : i32, i32
  }
}

</mosaic_0001>

<bundles_post_ra>
// kernel: char_lstm_forward.1
= control target key start
LH: loop header
LB: loop body
LE: loop exit
PB: predicated region body
PF: predicated region fallthrough
CT: control target
= control target key end

     0   :  { %v1719_v2 = vmov 0   ;;  %s2441_s0 = inlined_call_operand.vmem [shape: f32[8,2,512], index: 0, kind: input, shape index: {}]   ;;  %s2442_s1 = inlined_call_operand.vmem [shape: bf16[128,512], index: 1, kind: input, shape index: {}]   ;;  %s2443_s2 = inlined_call_operand.vmem [shape: f32[2,128], index: 2, kind: input, shape index: {}]   ;;  %s2444_s3 = inlined_call_operand.vmem [shape: f32[2,128], index: 3, kind: input, shape index: {}]   ;;  %s2445_s4 = inlined_call_operand.vmem [shape: f32[128,128], index: 4, kind: input, shape index: {}]   ;;  %s2446_s5 = inlined_call_operand.vmem [shape: f32[1,128], index: 5, kind: input, shape index: {}]   ;;  %s2447_s6 = inlined_call_operand.hbm [shape: f32[16,128], index: 6, kind: output, shape index: {0}]   ;;  %s2448_s7 = inlined_call_operand.vmem [shape: f32[2,128], index: 7, kind: output, shape index: {1}]   ;;  %s2449_s8 = inlined_call_operand.vmem [shape: f32[2,128], index: 8, kind: output, shape index: {2}]  }
   0x1   :  { %v1772_v0 = vld [vmem:[%s2442_s1 + $0x4] ss:$16 sps:$4 sm:$0xff]   ;;  %v1777_v1 = vld [vmem:[%s2442_s1 + $0xc] ss:$16 sps:$4 sm:$0xff]   ;;  %256 = vmatprep.mubr.bf16.mxu0 %v1719_v2  ;;  %297 = vmatprep.mubr.bf16.mxu1 %v1719_v2  ;;  %v1785_v3 = vld [vmem:[%s2442_s1] ss:$16 sps:$4 sm:$0xff]  }
   0x2   :  { %224 = vmatprep.subr.bf16.mxu0 %v1772_v0  ;;  %v1790_v4 = vld [vmem:[%s2442_s1 + $0x8] ss:$16 sps:$4 sm:$0xff]   ;;  %265 = vmatprep.subr.bf16.mxu1 %v1777_v1  ;;  %v1796_v5 = vld [vmem:[%s2442_s1 + $0x24] ss:$16 sps:$4 sm:$0xff]   ;;  %v1803_v6 = vld [vmem:[%s2442_s1 + $0x2c] ss:$16 sps:$4 sm:$0xff]  }
   0x3   :  { %225 = vmatpush1.bf16.msra.mxu0 %v1785_v3  ;;  %266 = vmatpush1.bf16.msra.mxu1 %v1790_v4  ;;  %v1808_v7 = vld [vmem:[%s2442_s1 + $0x20] ss:$16 sps:$4 sm:$0xff]   ;;  %v1814_v8 = vld [vmem:[%s2442_s1 + $0x28] ss:$16 sps:$4 sm:$0xff]   ;;  %v1820_v9 = vld [vmem:[%s2442_s1 + $0x44] ss:$16 sps:$4 sm:$0xff]  }
   0x4   :  { %226 = vmatprep.subr.bf16.mxu0 %v1796_v5  ;;  %267 = vmatprep.subr.bf16.mxu1 %v1803_v6  ;;  %v1825_v10 = vld [vmem:[%s2442_s1 + $0x4c] ss:$16 sps:$4 sm:$0xff]   ;;  %v1830_v11 = vld [vmem:[%s2442_s1 + $0x40] ss:$16 sps:$4 sm:$0xff]   ;;  %v1835_v12 = vld [vmem:[%s2442_s1 + $0x48] ss:$16 sps:$4 sm:$0xff]  }
   0x5   :  { %v1842_v13 = vld [vmem:[%s2442_s1 + $0x64] ss:$16 sps:$4 sm:$0xff]   ;;  %v1849_v14 = vld [vmem:[%s2442_s1 + $0x6c] ss:$16 sps:$4 sm:$0xff]   ;;  %v1854_v15 = vld [vmem:[%s2442_s1 + $0x60] ss:$16 sps:$4 sm:$0xff]  }
   0x6   :  { %v1861_v16 = vld [vmem:[%s2442_s1 + $0x68] ss:$16 sps:$4 sm:$0xff]   ;;  %v1866_v17 = vld [vmem:[%s2442_s1 + $0x84] ss:$16 sps:$4 sm:$0xff]   ;;  %v1873_v18 = vld [vmem:[%s2442_s1 + $0x8c] ss:$16 sps:$4 sm:$0xff]  }
   0x7   :  { %227 = vmatpush1.bf16.msra.mxu0 %v1808_v7  ;;  %268 = vmatpush1.bf16.msra.mxu1 %v1814_v8  ;;  %v1878_v19 = vld [vmem:[%s2442_s1 + $0x80] ss:$16 sps:$4 sm:$0xff]   ;;  %v1883_v20 = vld [vmem:[%s2442_s1 + $0x88] ss:$16 sps:$4 sm:$0xff]   ;;  %v1890_v21 = vld [vmem:[%s2442_s1 + $0xa4] ss:$16 sps:$4 sm:$0xff]  }
   0x8   :  { %228 = vmatprep.subr.bf16.mxu0 %v1820_v9  ;;  %269 = vmatprep.subr.bf16.mxu1 %v1825_v10  ;;  %v1897_v22 = vld [vmem:[%s2442_s1 + $0xac] ss:$16 sps:$4 sm:$0xff]   ;;  %v1904_v23 = vld [vmem:[%s2442_s1 + $0xa0] ss:$16 sps:$4 sm:$0xff]   ;;  %v1909_v24 = vld [vmem:[%s2442_s1 + $0xa8] ss:$16 sps:$4 sm:$0xff]  }
   0x9   :  { %v1916_v25 = vld [vmem:[%s2442_s1 + $0xc4] ss:$16 sps:$4 sm:$0xff]   ;;  %v1921_v26 = vld [vmem:[%s2442_s1 + $0xcc] ss:$16 sps:$4 sm:$0xff]  }
   0xb   :  { %229 = vmatpush1.bf16.msra.mxu0 %v1830_v11  ;;  %270 = vmatpush1.bf16.msra.mxu1 %v1835_v12 }
   0xc   :  { %230 = vmatprep.subr.bf16.mxu0 %v1842_v13  ;;  %271 = vmatprep.subr.bf16.mxu1 %v1849_v14 }
   0xf   :  { %231 = vmatpush1.bf16.msra.mxu0 %v1854_v15  ;;  %272 = vmatpush1.bf16.msra.mxu1 %v1861_v16 }
  0x10   :  { %232 = vmatprep.subr.bf16.mxu0 %v1866_v17  ;;  %273 = vmatprep.subr.bf16.mxu1 %v1873_v18 }
  0x13   :  { %233 = vmatpush1.bf16.msra.mxu0 %v1878_v19  ;;  %274 = vmatpush1.bf16.msra.mxu1 %v1883_v20 }
  0x14   :  { %234 = vmatprep.subr.bf16.mxu0 %v1890_v21  ;;  %275 = vmatprep.subr.bf16.mxu1 %v1897_v22 }
  0x15   :  { %14 = vsyncpa [#allocation3], 0  ;;  %v1928_v27 = vld [vmem:[%s2442_s1 + $0xc0] ss:$16 sps:$4 sm:$0xff]   ;;  %v1933_v28 = vld [vmem:[%s2442_s1 + $0xc8] ss:$16 sps:$4 sm:$0xff]   ;;  %v315_v37 = vlaneseq }
  0x16   :  { %v1940_v29 = vld [vmem:[%s2442_s1 + $0xe4] ss:$16 sps:$4 sm:$0xff]   ;;  %v1945_v30 = vld [vmem:[%s2442_s1 + $0xec] ss:$16 sps:$4 sm:$0xff]   ;;  %v1952_v31 = vld [vmem:[%s2442_s1 + $0xe0] ss:$16 sps:$4 sm:$0xff]  }
  0x17   :  { %235 = vmatpush1.bf16.msra.mxu0 %v1904_v23  ;;  %276 = vmatpush1.bf16.msra.mxu1 %v1909_v24  ;;  %v1957_v32 = vld [vmem:[%s2442_s1 + $0xe8] ss:$16 sps:$4 sm:$0xff]   ;;  %v60_v33 = vld [vmem:[%s2443_s2] sm:$0x3]  ;;  %v1720_v35 = vmov 1983009808  }
  0x18   :  { %236 = vmatprep.subr.bf16.mxu0 %v1916_v25  ;;  %277 = vmatprep.subr.bf16.mxu1 %v1921_v26  ;;  %v63_v34 = vpack.c.bf16 %v60_v33, %v60_v33  ;;  %v313_v36 = vunpack.c.l.s4 %v1720_v35  ;;  %v2002_v39 = vshrl.u32 %v315_v37, 7  ;;  %v62_v53 = vld [vmem:[%s2441_s0] sm:$0xff]  ;;  %vm1307_vm0 = vcmask 1040384   ;;  %s1721_s12 = smov [#allocation2]  }
  0x19   :  { %v61_v61 = vld [vmem:[%s2444_s3] sm:$0x3]  ;;  %vm1309_vm1 = vcmask 1041408   ;;  %vm1311_vm2 = vcmask 1042432   ;;  %vm1313_vm3 = vcmask 1043456   ;;  %vm1315_vm4 = vcmask 1044480  }
  0x1a   :  { %v314_v38 = vunpack.c.0.s8 %v313_v36  ;;  %vm1317_vm5 = vcmask 1045504   ;;  %vm1319_vm6 = vcmask 1046528   ;;  %s1435_s13 = sshll.u32 %s1721_s12, 4  ;;  %s1436_s13 = int_to_ptr.vmem [resolvable:$true] %s1435_s13 }
  0x1b   :  { %237 = vmatpush1.bf16.msra.mxu0 %v1928_v27  ;;  %278 = vmatpush1.bf16.msra.mxu1 %v1933_v28  ;;  %p1700_p1 = scmp.lt.s32.totalorder %s1436_s13, %s1436_s13 }
  0x1c   :  { %238 = vmatprep.subr.bf16.mxu0 %v1940_v29  ;;  %279 = vmatprep.subr.bf16.mxu1 %v1945_v30  ;;  %v2005_v42 = vsub.s32 %v314_v38, %v2002_v39 }
  0x1f   :  { %239 = vmatpush1.bf16.msra.mxu0 %v1952_v31  ;;  %280 = vmatpush1.bf16.msra.mxu1 %v1957_v32 }
  0x20   :  { %350 = vmatprep.subr.bf16.mxu0 %v1772_v0  ;;  %391 = vmatprep.subr.bf16.mxu1 %v1777_v1 }
  0x22   :  { %257 = vmatmul.mubr.bf16.vlgmr.msra.gmra.mrb[0].mxu0 %v63_v34  ;;  %298 = vmatmul.mubr.bf16.vlgmr.msra.gmra.mrb[0].mxu1 %v63_v34 }
  0x23   :  { %351 = vmatpush1.bf16.msra.mxu0 %v1785_v3  ;;  %392 = vmatpush1.bf16.msra.mxu1 %v1790_v4 }
  0x24   :  { %352 = vmatprep.subr.bf16.mxu0 %v1796_v5  ;;  %393 = vmatprep.subr.bf16.mxu1 %v1803_v6 }
  0x25   :  { %382 = vmatprep.mubr.bf16.mxu0 %v1719_v2  ;;  %423 = vmatprep.mubr.bf16.mxu1 %v1719_v2 }
  0x27   :  { %353 = vmatpush1.bf16.msra.mxu0 %v1808_v7  ;;  %394 = vmatpush1.bf16.msra.mxu1 %v1814_v8 }
  0x28   :  { %354 = vmatprep.subr.bf16.mxu0 %v1820_v9  ;;  %395 = vmatprep.subr.bf16.mxu1 %v1825_v10 }
  0x2b   :  { %355 = vmatpush1.bf16.msra.mxu0 %v1830_v11  ;;  %396 = vmatpush1.bf16.msra.mxu1 %v1835_v12 }
  0x2c   :  { %356 = vmatprep.subr.bf16.mxu0 %v1842_v13  ;;  %397 = vmatprep.subr.bf16.mxu1 %v1849_v14 }
  0x2f   :  { %357 = vmatpush1.bf16.msra.mxu0 %v1854_v15  ;;  %398 = vmatpush1.bf16.msra.mxu1 %v1861_v16 }
  0x30   :  { %358 = vmatprep.subr.bf16.mxu0 %v1866_v17  ;;  %399 = vmatprep.subr.bf16.mxu1 %v1873_v18 }
  0x33   :  { %359 = vmatpush1.bf16.msra.mxu0 %v1878_v19  ;;  %400 = vmatpush1.bf16.msra.mxu1 %v1883_v20 }
  0x34   :  { %360 = vmatprep.subr.bf16.mxu0 %v1890_v21  ;;  %401 = vmatprep.subr.bf16.mxu1 %v1897_v22 }
  0x37   :  { %361 = vmatpush1.bf16.msra.mxu0 %v1904_v23  ;;  %402 = vmatpush1.bf16.msra.mxu1 %v1909_v24 }
  0x38   :  { %362 = vmatprep.subr.bf16.mxu0 %v1916_v25  ;;  %403 = vmatprep.subr.bf16.mxu1 %v1921_v26 }
  0x3b   :  { %363 = vmatpush1.bf16.msra.mxu0 %v1928_v27  ;;  %404 = vmatpush1.bf16.msra.mxu1 %v1933_v28 }
  0x3c   :  { %364 = vmatprep.subr.bf16.mxu0 %v1940_v29  ;;  %405 = vmatprep.subr.bf16.mxu1 %v1945_v30 }
  0x3f   :  { %365 = vmatpush1.bf16.msra.mxu0 %v1952_v31  ;;  %406 = vmatpush1.bf16.msra.mxu1 %v1957_v32 }
  0x40   :  { %476 = vmatprep.subr.bf16.mxu0 %v1772_v0  ;;  %517 = vmatprep.subr.bf16.mxu1 %v1777_v1 }
  0xf5   :  { %v258_v40 = vpop.f32.mrb[0].mxu0  ;;  %v299_v41 = vpop.f32.mrb[0].mxu1 }
  0xf6   :  { %v260_v43 = vpop.f32.mrb[1].mxu0  ;;  %v301_v44 = vpop.f32.mrb[1].mxu1 }
  0xf7   :  { %v310_v45 = vcombine.low %v258_v40, %v260_v43  ;;  %v311_v46 = vcombine.low %v299_v41, %v301_v44  ;;  %v262_v47 = vpop.f32.mrb[2].mxu0  ;;  %v303_v48 = vpop.f32.mrb[2].mxu1 }
  0xf8   :  { %v263_v49 = vpop.f32.mrb[3].mxu0  ;;  %v304_v50 = vpop.f32.mrb[3].mxu1 }
  0xf9   :  { %v318_v51 = vrot.slane %v310_v45, %v2005_v42  ;;  %v325_v52 = vrot.slane %v311_v46, %v2005_v42 }
  0xfb   :  { %v326_v54 = vcombine.low %v318_v51, %v325_v52 }
  0xfd   :  { %v328_v55 = vadd.f32 %v326_v54, %v62_v53  ;;  %v1486_v54 = vld [vmem:[%s2441_s0 + $0x8] sm:$0xff] }
  0xff   :  { %v329_v56 = vmul.f32 0.5, %v328_v55  ;;  %v334_v57 = vrot.slane %v328_v55, 6 }
 0x101   :  { %1632 = vtanh.f32 %v329_v56 }
 0x102   :  { %1634 = vtanh.f32 %v334_v57 }
 0x10b   :  { %v1633_v58 = vpop.eup %1632 }
 0x10c   :  { %v331_v59 = vmul.f32 0.5, %v1633_v58  ;;  %v1635_v63 = vpop.eup %1634 }
 0x10e   :  { %v332_v60 = vadd.f32 0.5, %v331_v59 }
 0x110   :  { %v338_v62 = vrot.slane %v332_v60, 2  ;;  %v341_v34 = vmul.f32 %v1635_v63, %v332_v60  ;;  %v344_v36 = vrot.slane %v332_v60, 4 }
 0x112   :  { %v340_v33 = vmul.f32 %v338_v62, %v61_v61 }
 0x114   :  { %v2015_v35 = vadd.f32 %v341_v34, %v340_v33 }
 0x116   :  { %1636 = vtanh.f32 %v2015_v35 }
 0x120   :  { %v1637_v37 = vpop.eup %1636 }
 0x121   :  { %v2018_v38 = vmul.f32 %v1637_v37, %v344_v36 }
 0x123   :  { %v349_v40 = vpack.c.bf16 %v2018_v38, %v2018_v38 }
 0x125   :  { %383 = vmatmul.mubr.bf16.vlgmr.msra.gmra.mrb[4].mxu0 %v349_v40  ;;  %424 = vmatmul.mubr.bf16.vlgmr.msra.gmra.mrb[4].mxu1 %v349_v40 }
 0x126   :  { %477 = vmatpush1.bf16.msra.mxu0 %v1785_v3  ;;  %518 = vmatpush1.bf16.msra.mxu1 %v1790_v4 }
 0x127   :  { %478 = vmatprep.subr.bf16.mxu0 %v1796_v5  ;;  %519 = vmatprep.subr.bf16.mxu1 %v1803_v6 }
 0x128   :  { %508 = vmatprep.mubr.bf16.mxu0 %v1719_v2  ;;  %549 = vmatprep.mubr.bf16.mxu1 %v1719_v2 }
 0x12a   :  { %479 = vmatpush1.bf16.msra.mxu0 %v1808_v7  ;;  %520 = vmatpush1.bf16.msra.mxu1 %v1814_v8 }
 0x12b   :  { %480 = vmatprep.subr.bf16.mxu0 %v1820_v9  ;;  %521 = vmatprep.subr.bf16.mxu1 %v1825_v10 }
 0x12e   :  { %481 = vmatpush1.bf16.msra.mxu0 %v1830_v11  ;;  %522 = vmatpush1.bf16.msra.mxu1 %v1835_v12 }
 0x12f   :  { %482 = vmatprep.subr.bf16.mxu0 %v1842_v13  ;;  %523 = vmatprep.subr.bf16.mxu1 %v1849_v14 }
 0x132   :  { %483 = vmatpush1.bf16.msra.mxu0 %v1854_v15  ;;  %524 = vmatpush1.bf16.msra.mxu1 %v1861_v16 }
 0x133   :  { %484 = vmatprep.subr.bf16.mxu0 %v1866_v17  ;;  %525 = vmatprep.subr.bf16.mxu1 %v1873_v18 }
 0x136   :  { %485 = vmatpush1.bf16.msra.mxu0 %v1878_v19  ;;  %526 = vmatpush1.bf16.msra.mxu1 %v1883_v20 }
 0x137   :  { %486 = vmatprep.subr.bf16.mxu0 %v1890_v21  ;;  %527 = vmatprep.subr.bf16.mxu1 %v1897_v22 }
 0x13a   :  { %487 = vmatpush1.bf16.msra.mxu0 %v1904_v23  ;;  %528 = vmatpush1.bf16.msra.mxu1 %v1909_v24 }
 0x13b   :  { %488 = vmatprep.subr.bf16.mxu0 %v1916_v25  ;;  %529 = vmatprep.subr.bf16.mxu1 %v1921_v26 }
 0x13e   :  { %489 = vmatpush1.bf16.msra.mxu0 %v1928_v27  ;;  %530 = vmatpush1.bf16.msra.mxu1 %v1933_v28 }
 0x13f   :  { %490 = vmatprep.subr.bf16.mxu0 %v1940_v29  ;;  %531 = vmatprep.subr.bf16.mxu1 %v1945_v30 }
 0x142   :  { %491 = vmatpush1.bf16.msra.mxu0 %v1952_v31  ;;  %532 = vmatpush1.bf16.msra.mxu1 %v1957_v32 }
 0x143   :  { %602 = vmatprep.subr.bf16.mxu0 %v1772_v0  ;;  %643 = vmatprep.subr.bf16.mxu1 %v1777_v1 }
 0x1f8   :  { %v384_v41 = vpop.f32.mrb[4].mxu0  ;;  %v425_v43 = vpop.f32.mrb[4].mxu1 }
 0x1f9   :  { %v386_v44 = vpop.f32.mrb[5].mxu0  ;;  %v427_v45 = vpop.f32.mrb[5].mxu1 }
 0x1fa   :  { %v436_v46 = vcombine.low %v384_v41, %v386_v44  ;;  %v437_v47 = vcombine.low %v425_v43, %v427_v45  ;;  %v388_v48 = vpop.f32.mrb[6].mxu0  ;;  %v429_v49 = vpop.f32.mrb[6].mxu1 }
 0x1fb   :  { %v389_v50 = vpop.f32.mrb[7].mxu0  ;;  %v430_v51 = vpop.f32.mrb[7].mxu1 }
 0x1fc   :  { %v444_v52 = vrot.slane %v436_v46, %v2005_v42  ;;  %v451_v53 = vrot.slane %v437_v47, %v2005_v42 }
 0x1fe   :  { %v452_v55 = vcombine.low %v444_v52, %v451_v53 }
 0x200   :  { %v454_v56 = vadd.f32 %v1486_v54, %v452_v55  ;;  %v1487_v55 = vld [vmem:[%s2441_s0 + $0x10] sm:$0xff] }
 0x202   :  { %v455_v57 = vmul.f32 0.5, %v454_v56  ;;  %v460_v58 = vrot.slane %v454_v56, 6 }
 0x204   :  { %1638 = vtanh.f32 %v455_v57 }
 0x205   :  { %1640 = vtanh.f32 %v460_v58 }
 0x20e   :  { %v1639_v59 = vpop.eup %1638 }
 0x20f   :  { %v457_v60 = vmul.f32 0.5, %v1639_v59  ;;  %v1641_v63 = vpop.eup %1640 }
 0x211   :  { %v458_v61 = vadd.f32 0.5, %v457_v60 }
 0x213   :  { %v464_v62 = vrot.slane %v458_v61, 2  ;;  %v467_v34 = vmul.f32 %v1641_v63, %v458_v61  ;;  %v470_v37 = vrot.slane %v458_v61, 4 }
 0x215   :  { %v466_v33 = vmul.f32 %v464_v62, %v2015_v35 }
 0x217   :  { %v2062_v36 = vadd.f32 %v467_v34, %v466_v33 }
 0x219   :  { %1642 = vtanh.f32 %v2062_v36 }
 0x223   :  { %v1643_v40 = vpop.eup %1642 }
 0x224   :  { %v2065_v41 = vmul.f32 %v1643_v40, %v470_v37 }
 0x226   :  { %v475_v43 = vpack.c.bf16 %v2065_v41, %v2065_v41 }
 0x228   :  { %509 = vmatmul.mubr.bf16.vlgmr.msra.gmra.mrb[8].mxu0 %v475_v43  ;;  %550 = vmatmul.mubr.bf16.vlgmr.msra.gmra.mrb[8].mxu1 %v475_v43  ;;  %v2113_v43 = vsub.s32 0, %v2002_v39 }
 0x229   :  { %603 = vmatpush1.bf16.msra.mxu0 %v1785_v3  ;;  %644 = vmatpush1.bf16.msra.mxu1 %v1790_v4 }
 0x22a   :  { %604 = vmatprep.subr.bf16.mxu0 %v1796_v5  ;;  %645 = vmatprep.subr.bf16.mxu1 %v1803_v6 }
 0x22b   :  { %634 = vmatprep.mubr.bf16.mxu0 %v1719_v2  ;;  %675 = vmatprep.mubr.bf16.mxu1 %v1719_v2 }
 0x22d   :  { %605 = vmatpush1.bf16.msra.mxu0 %v1808_v7  ;;  %646 = vmatpush1.bf16.msra.mxu1 %v1814_v8 }
 0x22e   :  { %606 = vmatprep.subr.bf16.mxu0 %v1820_v9  ;;  %647 = vmatprep.subr.bf16.mxu1 %v1825_v10 }
 0x231   :  { %607 = vmatpush1.bf16.msra.mxu0 %v1830_v11  ;;  %648 = vmatpush1.bf16.msra.mxu1 %v1835_v12 }
 0x232   :  { %608 = vmatprep.subr.bf16.mxu0 %v1842_v13  ;;  %649 = vmatprep.subr.bf16.mxu1 %v1849_v14 }
 0x235   :  { %609 = vmatpush1.bf16.msra.mxu0 %v1854_v15  ;;  %650 = vmatpush1.bf16.msra.mxu1 %v1861_v16 }
 0x236   :  { %610 = vmatprep.subr.bf16.mxu0 %v1866_v17  ;;  %651 = vmatprep.subr.bf16.mxu1 %v1873_v18 }
 0x239   :  { %611 = vmatpush1.bf16.msra.mxu0 %v1878_v19  ;;  %652 = vmatpush1.bf16.msra.mxu1 %v1883_v20 }
 0x23a   :  { %612 = vmatprep.subr.bf16.mxu0 %v1890_v21  ;;  %653 = vmatprep.subr.bf16.mxu1 %v1897_v22 }
 0x23d   :  { %613 = vmatpush1.bf16.msra.mxu0 %v1904_v23  ;;  %654 = vmatpush1.bf16.msra.mxu1 %v1909_v24 }
 0x23e   :  { %614 = vmatprep.subr.bf16.mxu0 %v1916_v25  ;;  %655 = vmatprep.subr.bf16.mxu1 %v1921_v26 }
 0x241   :  { %615 = vmatpush1.bf16.msra.mxu0 %v1928_v27  ;;  %656 = vmatpush1.bf16.msra.mxu1 %v1933_v28 }
 0x242   :  { %616 = vmatprep.subr.bf16.mxu0 %v1940_v29  ;;  %657 = vmatprep.subr.bf16.mxu1 %v1945_v30 }
 0x245   :  { %617 = vmatpush1.bf16.msra.mxu0 %v1952_v31  ;;  %658 = vmatpush1.bf16.msra.mxu1 %v1957_v32 }
 0x246   :  { %728 = vmatprep.subr.bf16.mxu0 %v1772_v0  ;;  %769 = vmatprep.subr.bf16.mxu1 %v1777_v1 }
 0x2fb   :  { %v510_v35 = vpop.f32.mrb[8].mxu0  ;;  %v551_v44 = vpop.f32.mrb[8].mxu1 }
 0x2fc   :  { %v512_v45 = vpop.f32.mrb[9].mxu0  ;;  %v553_v46 = vpop.f32.mrb[9].mxu1 }
 0x2fd   :  { %v562_v47 = vcombine.low %v510_v35, %v512_v45  ;;  %v563_v48 = vcombine.low %v551_v44, %v553_v46  ;;  %v514_v49 = vpop.f32.mrb[10].mxu0  ;;  %v555_v50 = vpop.f32.mrb[10].mxu1  ;;  %v2116_v35 = vsub.s32 1, %v2002_v39  ;;  %v1233_v46 = vrot.slane %v2065_v41, %v2113_v43 }
 0x2fe   :  { %v515_v51 = vpop.f32.mrb[11].mxu0  ;;  %v556_v52 = vpop.f32.mrb[11].mxu1 }
 0x2ff   :  { %v570_v53 = vrot.slane %v562_v47, %v2005_v42  ;;  %v577_v54 = vrot.slane %v563_v48, %v2005_v42  ;;  %v1308_v39 = vsel %vm1307_vm0, %v2018_v38, %v1233_v46 }
 0x301   :  { %v578_v56 = vcombine.low %v570_v53, %v577_v54 }
 0x303   :  { %v580_v57 = vadd.f32 %v1487_v55, %v578_v56 }
 0x305   :  { %v581_v58 = vmul.f32 0.5, %v580_v57  ;;  %v586_v59 = vrot.slane %v580_v57, 6 }
 0x307   :  { %1644 = vtanh.f32 %v581_v58 }
 0x308   :  { %1646 = vtanh.f32 %v586_v59 }
 0x311   :  { %v1645_v60 = vpop.eup %1644 }
 0x312   :  { %v583_v61 = vmul.f32 0.5, %v1645_v60  ;;  %v1647_v33 = vpop.eup %1646 }
 0x314   :  { %v584_v62 = vadd.f32 0.5, %v583_v61 }
 0x316   :  { %v590_v63 = vrot.slane %v584_v62, 2  ;;  %v593_v37 = vmul.f32 %v1647_v33, %v584_v62  ;;  %v596_v44 = vrot.slane %v584_v62, 4  ;;  %v1488_v33 = vld [vmem:[%s2441_s0 + $0x18] sm:$0xff] }
 0x318   :  { %v592_v34 = vmul.f32 %v590_v63, %v2062_v36  ;;  %v1275_v36 = vrot.slane %v2018_v38, %v2116_v35 }
 0x31a   :  { %v2109_v40 = vadd.f32 %v593_v37, %v592_v34  ;;  %v1321_v51 = vsel %vm1307_vm0, %v1275_v36, %v2065_v41 }
 0x31c   :  { %1648 = vtanh.f32 %v2109_v40 }
 0x326   :  { %v1649_v45 = vpop.eup %1648 }
 0x327   :  { %v598_v47 = vmul.f32 %v1649_v45, %v596_v44 }
 0x329   :  { %v601_v48 = vpack.c.bf16 %v598_v47, %v598_v47  ;;  %v1239_v49 = vrot.slane %v598_v47, %v2113_v43  ;;  %v1280_v50 = vrot.slane %v598_v47, %v2116_v35 }
 0x32b   :  { %635 = vmatmul.mubr.bf16.vlgmr.msra.gmra.mrb[12].mxu0 %v601_v48  ;;  %676 = vmatmul.mubr.bf16.vlgmr.msra.gmra.mrb[12].mxu1 %v601_v48  ;;  %v2126_v52 = vsel %vm1309_vm1, %v1308_v39, %v1239_v49  ;;  %v2128_v53 = vsel %vm1309_vm1, %v1321_v51, %v1280_v50 }
 0x32c   :  { %729 = vmatpush1.bf16.msra.mxu0 %v1785_v3  ;;  %770 = vmatpush1.bf16.msra.mxu1 %v1790_v4 }
 0x32d   :  { %730 = vmatprep.subr.bf16.mxu0 %v1796_v5  ;;  %771 = vmatprep.subr.bf16.mxu1 %v1803_v6 }
 0x32e   :  { %760 = vmatprep.mubr.bf16.mxu0 %v1719_v2  ;;  %801 = vmatprep.mubr.bf16.mxu1 %v1719_v2 }
 0x330   :  { %731 = vmatpush1.bf16.msra.mxu0 %v1808_v7  ;;  %772 = vmatpush1.bf16.msra.mxu1 %v1814_v8 }
 0x331   :  { %732 = vmatprep.subr.bf16.mxu0 %v1820_v9  ;;  %773 = vmatprep.subr.bf16.mxu1 %v1825_v10 }
 0x334   :  { %733 = vmatpush1.bf16.msra.mxu0 %v1830_v11  ;;  %774 = vmatpush1.bf16.msra.mxu1 %v1835_v12 }
 0x335   :  { %734 = vmatprep.subr.bf16.mxu0 %v1842_v13  ;;  %775 = vmatprep.subr.bf16.mxu1 %v1849_v14 }
 0x338   :  { %735 = vmatpush1.bf16.msra.mxu0 %v1854_v15  ;;  %776 = vmatpush1.bf16.msra.mxu1 %v1861_v16 }
 0x339   :  { %736 = vmatprep.subr.bf16.mxu0 %v1866_v17  ;;  %777 = vmatprep.subr.bf16.mxu1 %v1873_v18 }
 0x33c   :  { %737 = vmatpush1.bf16.msra.mxu0 %v1878_v19  ;;  %778 = vmatpush1.bf16.msra.mxu1 %v1883_v20 }
 0x33d   :  { %738 = vmatprep.subr.bf16.mxu0 %v1890_v21  ;;  %779 = vmatprep.subr.bf16.mxu1 %v1897_v22 }
 0x340   :  { %739 = vmatpush1.bf16.msra.mxu0 %v1904_v23  ;;  %780 = vmatpush1.bf16.msra.mxu1 %v1909_v24 }
 0x341   :  { %740 = vmatprep.subr.bf16.mxu0 %v1916_v25  ;;  %781 = vmatprep.subr.bf16.mxu1 %v1921_v26 }
 0x344   :  { %741 = vmatpush1.bf16.msra.mxu0 %v1928_v27  ;;  %782 = vmatpush1.bf16.msra.mxu1 %v1933_v28 }
 0x345   :  { %742 = vmatprep.subr.bf16.mxu0 %v1940_v29  ;;  %783 = vmatprep.subr.bf16.mxu1 %v1945_v30 }
 0x348   :  { %743 = vmatpush1.bf16.msra.mxu0 %v1952_v31  ;;  %784 = vmatpush1.bf16.msra.mxu1 %v1957_v32 }
 0x349   :  { %854 = vmatprep.subr.bf16.mxu0 %v1772_v0  ;;  %895 = vmatprep.subr.bf16.mxu1 %v1777_v1 }
 0x3fe   :  { %v636_v38 = vpop.f32.mrb[12].mxu0  ;;  %v677_v41 = vpop.f32.mrb[12].mxu1 }
 0x3ff   :  { %v638_v54 = vpop.f32.mrb[13].mxu0  ;;  %v679_v55 = vpop.f32.mrb[13].mxu1 }
 0x400   :  { %v688_v56 = vcombine.low %v636_v38, %v638_v54  ;;  %v689_v57 = vcombine.low %v677_v41, %v679_v55  ;;  %v640_v58 = vpop.f32.mrb[14].mxu0  ;;  %v681_v59 = vpop.f32.mrb[14].mxu1 }
 0x401   :  { %v641_v60 = vpop.f32.mrb[15].mxu0  ;;  %v682_v61 = vpop.f32.mrb[15].mxu1 }
 0x402   :  { %v696_v62 = vrot.slane %v688_v56, %v2005_v42  ;;  %v703_v63 = vrot.slane %v689_v57, %v2005_v42 }
 0x404   :  { %v704_v34 = vcombine.low %v696_v62, %v703_v63 }
 0x406   :  { %v706_v37 = vadd.f32 %v1488_v33, %v704_v34 }
 0x408   :  { %v707_v44 = vmul.f32 0.5, %v706_v37  ;;  %v712_v45 = vrot.slane %v706_v37, 6 }
 0x40a   :  { %1650 = vtanh.f32 %v707_v44 }
 0x40b   :  { %1652 = vtanh.f32 %v712_v45 }
 0x414   :  { %v1651_v46 = vpop.eup %1650 }
 0x415   :  { %v709_v47 = vmul.f32 0.5, %v1651_v46  ;;  %v1653_v49 = vpop.eup %1652  ;;  %v1489_v46 = vld [vmem:[%s2441_s0 + $0x20] sm:$0xff] }
 0x417   :  { %v710_v36 = vadd.f32 0.5, %v709_v47 }
 0x419   :  { %v716_v48 = vrot.slane %v710_v36, 2  ;;  %v719_v51 = vmul.f32 %v1653_v49, %v710_v36  ;;  %v722_v38 = vrot.slane %v710_v36, 4 }
 0x41b   :  { %v718_v50 = vmul.f32 %v716_v48, %v2109_v40 }
 0x41d   :  { %v2170_v39 = vadd.f32 %v719_v51, %v718_v50 }
 0x41f   :  { %1654 = vtanh.f32 %v2170_v39 }
 0x429   :  { %v1655_v41 = vpop.eup %1654 }
 0x42a   :  { %v724_v54 = vmul.f32 %v1655_v41, %v722_v38 }
 0x42c   :  { %v727_v55 = vpack.c.bf16 %v724_v54, %v724_v54  ;;  %v1285_v56 = vrot.slane %v724_v54, %v2116_v35  ;;  %v1245_v57 = vrot.slane %v724_v54, %v2113_v43 }
 0x42e   :  { %761 = vmatmul.mubr.bf16.vlgmr.msra.gmra.mrb[16].mxu0 %v727_v55  ;;  %802 = vmatmul.mubr.bf16.vlgmr.msra.gmra.mrb[16].mxu1 %v727_v55  ;;  %v2176_v58 = vsel %vm1311_vm2, %v2126_v52, %v1245_v57  ;;  %v2179_v40 = vsel %vm1311_vm2, %v2128_v53, %v1285_v56 }
 0x42f   :  { %855 = vmatpush1.bf16.msra.mxu0 %v1785_v3  ;;  %896 = vmatpush1.bf16.msra.mxu1 %v1790_v4 }
 0x430   :  { %856 = vmatprep.subr.bf16.mxu0 %v1796_v5  ;;  %897 = vmatprep.subr.bf16.mxu1 %v1803_v6 }
 0x431   :  { %886 = vmatprep.mubr.bf16.mxu0 %v1719_v2  ;;  %927 = vmatprep.mubr.bf16.mxu1 %v1719_v2 }
 0x433   :  { %857 = vmatpush1.bf16.msra.mxu0 %v1808_v7  ;;  %898 = vmatpush1.bf16.msra.mxu1 %v1814_v8 }
 0x434   :  { %858 = vmatprep.subr.bf16.mxu0 %v1820_v9  ;;  %899 = vmatprep.subr.bf16.mxu1 %v1825_v10 }
 0x437   :  { %859 = vmatpush1.bf16.msra.mxu0 %v1830_v11  ;;  %900 = vmatpush1.bf16.msra.mxu1 %v1835_v12 }
 0x438   :  { %860 = vmatprep.subr.bf16.mxu0 %v1842_v13  ;;  %901 = vmatprep.subr.bf16.mxu1 %v1849_v14 }
 0x43b   :  { %861 = vmatpush1.bf16.msra.mxu0 %v1854_v15  ;;  %902 = vmatpush1.bf16.msra.mxu1 %v1861_v16 }
 0x43c   :  { %862 = vmatprep.subr.bf16.mxu0 %v1866_v17  ;;  %903 = vmatprep.subr.bf16.mxu1 %v1873_v18 }
 0x43f   :  { %863 = vmatpush1.bf16.msra.mxu0 %v1878_v19  ;;  %904 = vmatpush1.bf16.msra.mxu1 %v1883_v20 }
 0x440   :  { %864 = vmatprep.subr.bf16.mxu0 %v1890_v21  ;;  %905 = vmatprep.subr.bf16.mxu1 %v1897_v22 }
 0x443   :  { %865 = vmatpush1.bf16.msra.mxu0 %v1904_v23  ;;  %906 = vmatpush1.bf16.msra.mxu1 %v1909_v24 }
 0x444   :  { %866 = vmatprep.subr.bf16.mxu0 %v1916_v25  ;;  %907 = vmatprep.subr.bf16.mxu1 %v1921_v26 }
 0x447   :  { %867 = vmatpush1.bf16.msra.mxu0 %v1928_v27  ;;  %908 = vmatpush1.bf16.msra.mxu1 %v1933_v28 }
 0x448   :  { %868 = vmatprep.subr.bf16.mxu0 %v1940_v29  ;;  %909 = vmatprep.subr.bf16.mxu1 %v1945_v30 }
 0x44b   :  { %869 = vmatpush1.bf16.msra.mxu0 %v1952_v31  ;;  %910 = vmatpush1.bf16.msra.mxu1 %v1957_v32 }
 0x44c   :  { %980 = vmatprep.subr.bf16.mxu0 %v1772_v0  ;;  %1021 = vmatprep.subr.bf16.mxu1 %v1777_v1 }
 0x501   :  { %v762_v52 = vpop.f32.mrb[16].mxu0  ;;  %v803_v53 = vpop.f32.mrb[16].mxu1 }
 0x502   :  { %v764_v59 = vpop.f32.mrb[17].mxu0  ;;  %v805_v60 = vpop.f32.mrb[17].mxu1 }
 0x503   :  { %v814_v61 = vcombine.low %v762_v52, %v764_v59  ;;  %v815_v62 = vcombine.low %v803_v53, %v805_v60  ;;  %v766_v63 = vpop.f32.mrb[18].mxu0  ;;  %v807_v33 = vpop.f32.mrb[18].mxu1 }
 0x504   :  { %v767_v34 = vpop.f32.mrb[19].mxu0  ;;  %v808_v37 = vpop.f32.mrb[19].mxu1 }
 0x505   :  { %v822_v44 = vrot.slane %v814_v61, %v2005_v42  ;;  %v829_v45 = vrot.slane %v815_v62, %v2005_v42 }
 0x507   :  { %v830_v47 = vcombine.low %v822_v44, %v829_v45 }
 0x509   :  { %v832_v36 = vadd.f32 %v1489_v46, %v830_v47 }
 0x50b   :  { %v833_v48 = vmul.f32 0.5, %v832_v36  ;;  %v838_v49 = vrot.slane %v832_v36, 6 }
 0x50d   :  { %1656 = vtanh.f32 %v833_v48 }
 0x50e   :  { %1658 = vtanh.f32 %v838_v49 }
 0x517   :  { %v1657_v50 = vpop.eup %1656 }
 0x518   :  { %v835_v51 = vmul.f32 0.5, %v1657_v50  ;;  %v1659_v54 = vpop.eup %1658 }
 0x51a   :  { %v836_v38 = vadd.f32 0.5, %v835_v51 }
 0x51c   :  { %v842_v41 = vrot.slane %v836_v38, 2  ;;  %v845_v56 = vmul.f32 %v1659_v54, %v836_v38  ;;  %v848_v52 = vrot.slane %v836_v38, 4  ;;  %v1680_v54 = vld [vmem:[%s2442_s1] ss:$16 sps:$4 sm:$0xff]  }
 0x51e   :  { %v844_v55 = vmul.f32 %v842_v41, %v2170_v39 }
 0x520   :  { %v2221_v57 = vadd.f32 %v845_v56, %v844_v55  ;;  %v1681_v55 = vld [vmem:[%s2442_s1 + $0x8] ss:$16 sps:$4 sm:$0xff]   ;;  %v1682_v56 = vld [vmem:[%s2442_s1 + $0x24] ss:$16 sps:$4 sm:$0xff]  }
 0x522   :  { %1660 = vtanh.f32 %v2221_v57 }
 0x52c   :  { %v1661_v53 = vpop.eup %1660 }
 0x52d   :  { %v850_v59 = vmul.f32 %v1661_v53, %v848_v52  ;;  %v1684_v52 = vld [vmem:[%s2442_s1 + $0x20] ss:$16 sps:$4 sm:$0xff]   ;;  %v1685_v53 = vld [vmem:[%s2442_s1 + $0x28] ss:$16 sps:$4 sm:$0xff]  }
 0x52f   :  { %v853_v60 = vpack.c.bf16 %v850_v59, %v850_v59  ;;  %v1251_v61 = vrot.slane %v850_v59, %v2113_v43  ;;  %v1290_v62 = vrot.slane %v850_v59, %v2116_v35  ;;  %v1686_v59 = vld [vmem:[%s2442_s1 + $0x44] ss:$16 sps:$4 sm:$0xff]  }
 0x531   :  { %887 = vmatmul.mubr.bf16.vlgmr.msra.gmra.mrb[20].mxu0 %v853_v60  ;;  %928 = vmatmul.mubr.bf16.vlgmr.msra.gmra.mrb[20].mxu1 %v853_v60  ;;  %v2227_v63 = vsel %vm1313_vm3, %v2176_v58, %v1251_v61  ;;  %v2230_v39 = vsel %vm1313_vm3, %v2179_v40, %v1290_v62  ;;  %v1687_v60 = vld [vmem:[%s2442_s1 + $0x4c] ss:$16 sps:$4 sm:$0xff]   ;;  %v1689_v61 = vld [vmem:[%s2442_s1 + $0x48] ss:$16 sps:$4 sm:$0xff]   ;;  %v1690_v62 = vld [vmem:[%s2442_s1 + $0x64] ss:$16 sps:$4 sm:$0xff]  }
 0x532   :  { %981 = vmatpush1.bf16.msra.mxu0 %v1785_v3  ;;  %1022 = vmatpush1.bf16.msra.mxu1 %v1790_v4 }
 0x533   :  { %982 = vmatprep.subr.bf16.mxu0 %v1796_v5  ;;  %1023 = vmatprep.subr.bf16.mxu1 %v1803_v6 }
 0x534   :  { %1012 = vmatprep.mubr.bf16.mxu0 %v1719_v2  ;;  %1053 = vmatprep.mubr.bf16.mxu1 %v1719_v2 }
 0x536   :  { %983 = vmatpush1.bf16.msra.mxu0 %v1808_v7  ;;  %1024 = vmatpush1.bf16.msra.mxu1 %v1814_v8 }
 0x537   :  { %984 = vmatprep.subr.bf16.mxu0 %v1820_v9  ;;  %1025 = vmatprep.subr.bf16.mxu1 %v1825_v10 }
 0x53a   :  { %985 = vmatpush1.bf16.msra.mxu0 %v1830_v11  ;;  %1026 = vmatpush1.bf16.msra.mxu1 %v1835_v12 }
 0x53b   :  { %986 = vmatprep.subr.bf16.mxu0 %v1842_v13  ;;  %1027 = vmatprep.subr.bf16.mxu1 %v1849_v14 }
 0x53e   :  { %987 = vmatpush1.bf16.msra.mxu0 %v1854_v15  ;;  %1028 = vmatpush1.bf16.msra.mxu1 %v1861_v16 }
 0x53f   :  { %988 = vmatprep.subr.bf16.mxu0 %v1866_v17  ;;  %1029 = vmatprep.subr.bf16.mxu1 %v1873_v18 }
 0x542   :  { %989 = vmatpush1.bf16.msra.mxu0 %v1878_v19  ;;  %1030 = vmatpush1.bf16.msra.mxu1 %v1883_v20 }
 0x543   :  { %990 = vmatprep.subr.bf16.mxu0 %v1890_v21  ;;  %1031 = vmatprep.subr.bf16.mxu1 %v1897_v22 }
 0x546   :  { %991 = vmatpush1.bf16.msra.mxu0 %v1904_v23  ;;  %1032 = vmatpush1.bf16.msra.mxu1 %v1909_v24 }
 0x547   :  { %992 = vmatprep.subr.bf16.mxu0 %v1916_v25  ;;  %1033 = vmatprep.subr.bf16.mxu1 %v1921_v26 }
 0x54a   :  { %993 = vmatpush1.bf16.msra.mxu0 %v1928_v27  ;;  %1034 = vmatpush1.bf16.msra.mxu1 %v1933_v28 }
 0x54b   :  { %994 = vmatprep.subr.bf16.mxu0 %v1940_v29  ;;  %1035 = vmatprep.subr.bf16.mxu1 %v1945_v30 }
 0x54e   :  { %995 = vmatpush1.bf16.msra.mxu0 %v1952_v31  ;;  %1036 = vmatpush1.bf16.msra.mxu1 %v1957_v32 }
 0x54f   :  { %1106 = vmatprep.subr.bf16.mxu0 %v1772_v0  ;;  %1147 = vmatprep.subr.bf16.mxu1 %v1777_v1  ;;  %v1490_v0 = vld [vmem:[%s2441_s0 + $0x28] sm:$0xff] }
 0x604   :  { %v888_v3 = vpop.f32.mrb[20].mxu0  ;;  %v929_v4 = vpop.f32.mrb[20].mxu1 }
 0x605   :  { %v890_v5 = vpop.f32.mrb[21].mxu0  ;;  %v931_v6 = vpop.f32.mrb[21].mxu1 }
 0x606   :  { %v940_v7 = vcombine.low %v888_v3, %v890_v5  ;;  %v941_v8 = vcombine.low %v929_v4, %v931_v6  ;;  %v892_v9 = vpop.f32.mrb[22].mxu0  ;;  %v933_v10 = vpop.f32.mrb[22].mxu1  ;;  %v1693_v3 = vld [vmem:[%s2442_s1 + $0x68] ss:$16 sps:$4 sm:$0xff]   ;;  %v1694_v4 = vld [vmem:[%s2442_s1 + $0x84] ss:$16 sps:$4 sm:$0xff]  }
 0x607   :  { %v893_v11 = vpop.f32.mrb[23].mxu0  ;;  %v934_v12 = vpop.f32.mrb[23].mxu1 }
 0x608   :  { %v948_v13 = vrot.slane %v940_v7, %v2005_v42  ;;  %v955_v14 = vrot.slane %v941_v8, %v2005_v42 }
 0x60a   :  { %v956_v15 = vcombine.low %v948_v13, %v955_v14 }
 0x60c   :  { %v958_v1 = vadd.f32 %v1490_v0, %v956_v15 }
 0x60e   :  { %v959_v16 = vmul.f32 0.5, %v958_v1  ;;  %v964_v17 = vrot.slane %v958_v1, 6 }
 0x610   :  { %1662 = vtanh.f32 %v959_v16 }
 0x611   :  { %1664 = vtanh.f32 %v964_v17 }
 0x61a   :  { %v1663_v58 = vpop.eup %1662 }
 0x61b   :  { %v961_v40 = vmul.f32 0.5, %v1663_v58  ;;  %v1665_v37 = vpop.eup %1664 }
 0x61d   :  { %v962_v33 = vadd.f32 0.5, %v961_v40 }
 0x61f   :  { %v968_v34 = vrot.slane %v962_v33, 2  ;;  %v971_v45 = vmul.f32 %v1665_v37, %v962_v33  ;;  %v974_v47 = vrot.slane %v962_v33, 4  ;;  %v1329_v37 = vld [vmem:[%s2445_s4 + $0x8] sm:$0xff] }
 0x621   :  { %v970_v44 = vmul.f32 %v968_v34, %v2221_v57  ;;  %v1683_v57 = vld [vmem:[%s2442_s1 + $0x2c] ss:$16 sps:$4 sm:$0xff]   ;;  %v1328_v34 = vld [vmem:[%s2445_s4] sm:$0xff] }
 0x623   :  { %v2272_v46 = vadd.f32 %v971_v45, %v970_v44  ;;  %v1547_v44 = vpack.c.bf16 %v1329_v37, %v1328_v34  ;;  %v1330_v45 = vld [vmem:[%s2445_s4 + $0x10] sm:$0xff] }
 0x625   :  { %1666 = vtanh.f32 %v2272_v46 }
 0x62f   :  { %v1667_v36 = vpop.eup %1666 }
 0x630   :  { %v976_v48 = vmul.f32 %v1667_v36, %v974_v47  ;;  %v1332_v36 = vld [vmem:[%s2445_s4 + $0x20] sm:$0xff] }
 0x632   :  { %v979_v49 = vpack.c.bf16 %v976_v48, %v976_v48  ;;  %v1257_v50 = vrot.slane %v976_v48, %v2113_v43  ;;  %v1295_v51 = vrot.slane %v976_v48, %v2116_v35  ;;  %v1333_v48 = vld [vmem:[%s2445_s4 + $0x28] sm:$0xff] }
 0x634   :  { %1013 = vmatmul.mubr.bf16.vlgmr.msra.gmra.mrb[24].mxu0 %v979_v49  ;;  %1054 = vmatmul.mubr.bf16.vlgmr.msra.gmra.mrb[24].mxu1 %v979_v49  ;;  %v2278_v38 = vsel %vm1315_vm4, %v2227_v63, %v1257_v50  ;;  %v2281_v41 = vsel %vm1315_vm4, %v2230_v39, %v1295_v51  ;;  %v1691_v63 = vld [vmem:[%s2442_s1 + $0x6c] ss:$16 sps:$4 sm:$0xff]   ;;  %v1692_v39 = vld [vmem:[%s2442_s1 + $0x60] ss:$16 sps:$4 sm:$0xff]   ;;  %v1555_v49 = vpack.c.bf16 %v1333_v48, %v1332_v36 }
 0x635   :  { %1107 = vmatpush1.bf16.msra.mxu0 %v1680_v54  ;;  %1148 = vmatpush1.bf16.msra.mxu1 %v1681_v55  ;;  %v1334_v50 = vld [vmem:[%s2445_s4 + $0x30] sm:$0xff]  ;;  %v1335_v51 = vld [vmem:[%s2445_s4 + $0x38] sm:$0xff]  ;;  %v1337_v54 = vld [vmem:[%s2445_s4 + $0x48] sm:$0xff] }
 0x636   :  { %1108 = vmatprep.subr.bf16.mxu0 %v1682_v56  ;;  %1149 = vmatprep.subr.bf16.mxu1 %v1683_v57  ;;  %v1338_v56 = vld [vmem:[%s2445_s4 + $0x50] sm:$0xff]  ;;  %v1339_v57 = vld [vmem:[%s2445_s4 + $0x58] sm:$0xff] }
 0x637   :  { %1138 = vmatprep.mubr.bf16.mxu0 %v1719_v2  ;;  %1179 = vmatprep.mubr.bf16.mxu1 %v1719_v2  ;;  %v1688_v2 = vld [vmem:[%s2442_s1 + $0x40] ss:$16 sps:$4 sm:$0xff]  }
 0x639   :  { %1109 = vmatpush1.bf16.msra.mxu0 %v1684_v52  ;;  %1150 = vmatpush1.bf16.msra.mxu1 %v1685_v53  ;;  %v1567_v52 = vpack.c.bf16 %v1339_v57, %v1338_v56  ;;  %v1340_v53 = vld [vmem:[%s2445_s4 + $0x60] sm:$0xff] }
 0x63a   :  { %1110 = vmatprep.subr.bf16.mxu0 %v1686_v59  ;;  %1151 = vmatprep.subr.bf16.mxu1 %v1687_v60  ;;  %v1341_v59 = vld [vmem:[%s2445_s4 + $0x68] sm:$0xff] }
 0x63b   :  { %v1571_v60 = vpack.c.bf16 %v1341_v59, %v1340_v53 }
 0x63d   :  { %1111 = vmatpush1.bf16.msra.mxu0 %v1688_v2  ;;  %1152 = vmatpush1.bf16.msra.mxu1 %v1689_v61  ;;  %v1342_v2 = vld [vmem:[%s2445_s4 + $0x70] sm:$0xff]  ;;  %v1343_v61 = vld [vmem:[%s2445_s4 + $0x78] sm:$0xff] }
 0x63e   :  { %1112 = vmatprep.subr.bf16.mxu0 %v1690_v62  ;;  %1153 = vmatprep.subr.bf16.mxu1 %v1691_v63  ;;  %v1575_v62 = vpack.c.bf16 %v1343_v61, %v1342_v2 }
 0x641   :  { %1113 = vmatpush1.bf16.msra.mxu0 %v1692_v39  ;;  %1154 = vmatpush1.bf16.msra.mxu1 %v1693_v3 }
 0x642   :  { %1114 = vmatprep.subr.bf16.mxu0 %v1694_v4  ;;  %1155 = vmatprep.subr.bf16.mxu1 %v1873_v18 }
 0x645   :  { %1115 = vmatpush1.bf16.msra.mxu0 %v1878_v19  ;;  %1156 = vmatpush1.bf16.msra.mxu1 %v1883_v20 }
 0x646   :  { %1116 = vmatprep.subr.bf16.mxu0 %v1890_v21  ;;  %1157 = vmatprep.subr.bf16.mxu1 %v1897_v22 }
 0x649   :  { %1117 = vmatpush1.bf16.msra.mxu0 %v1904_v23  ;;  %1158 = vmatpush1.bf16.msra.mxu1 %v1909_v24 }
 0x64a   :  { %1118 = vmatprep.subr.bf16.mxu0 %v1916_v25  ;;  %1159 = vmatprep.subr.bf16.mxu1 %v1921_v26 }
 0x64d   :  { %1119 = vmatpush1.bf16.msra.mxu0 %v1928_v27  ;;  %1160 = vmatpush1.bf16.msra.mxu1 %v1933_v28 }
 0x64e   :  { %1120 = vmatprep.subr.bf16.mxu0 %v1940_v29  ;;  %1161 = vmatprep.subr.bf16.mxu1 %v1945_v30  ;;  %v1491_v30 = vld [vmem:[%s2441_s0 + $0x30] sm:$0xff] }
 0x651   :  { %1121 = vmatpush1.bf16.msra.mxu0 %v1952_v31  ;;  %1162 = vmatpush1.bf16.msra.mxu1 %v1957_v32 }
 0x652   :  { %1548 = vmatprep.subr.bf16.mxu0 %v1547_v44 }
 0x707   :  { %v1014_v18 = vpop.f32.mrb[24].mxu0  ;;  %v1055_v19 = vpop.f32.mrb[24].mxu1 }
 0x708   :  { %v1016_v20 = vpop.f32.mrb[25].mxu0  ;;  %v1057_v21 = vpop.f32.mrb[25].mxu1 }
 0x709   :  { %v1066_v22 = vcombine.low %v1014_v18, %v1016_v20  ;;  %v1067_v23 = vcombine.low %v1055_v19, %v1057_v21  ;;  %v1018_v24 = vpop.f32.mrb[26].mxu0  ;;  %v1059_v25 = vpop.f32.mrb[26].mxu1 }
 0x70a   :  { %v1019_v26 = vpop.f32.mrb[27].mxu0  ;;  %v1060_v27 = vpop.f32.mrb[27].mxu1 }
 0x70b   :  { %v1074_v28 = vrot.slane %v1066_v22, %v2005_v42  ;;  %v1081_v29 = vrot.slane %v1067_v23, %v2005_v42  ;;  %v1492_v26 = vld [vmem:[%s2441_s0 + $0x38] sm:$0xff] }
 0x70d   :  { %v1082_v31 = vcombine.low %v1074_v28, %v1081_v29 }
 0x70f   :  { %v1084_v32 = vadd.f32 %v1491_v30, %v1082_v31 }
 0x711   :  { %v1085_v5 = vmul.f32 0.5, %v1084_v32  ;;  %v1090_v6 = vrot.slane %v1084_v32, 6 }
 0x713   :  { %1668 = vtanh.f32 %v1085_v5 }
 0x714   :  { %1670 = vtanh.f32 %v1090_v6 }
 0x71d   :  { %v1669_v7 = vpop.eup %1668 }
 0x71e   :  { %v1087_v8 = vmul.f32 0.5, %v1669_v7  ;;  %v1671_v11 = vpop.eup %1670 }
 0x720   :  { %v1088_v9 = vadd.f32 0.5, %v1087_v8 }
 0x722   :  { %v1094_v10 = vrot.slane %v1088_v9, 2  ;;  %v1097_v13 = vmul.f32 %v1671_v11, %v1088_v9  ;;  %v1100_v0 = vrot.slane %v1088_v9, 4 }
 0x724   :  { %v1096_v12 = vmul.f32 %v1094_v10, %v2272_v46  ;;  %v1331_v46 = vld [vmem:[%s2445_s4 + $0x18] sm:$0xff] }
 0x725   :  { %v1551_v47 = vpack.c.bf16 %v1331_v46, %v1330_v45 }
 0x726   :  { %v2351_v14 = vadd.f32 %v1097_v13, %v1096_v12 }
 0x728   :  { %1672 = vtanh.f32 %v2351_v14 }
 0x732   :  { %v1673_v15 = vpop.eup %1672 }
 0x733   :  { %v1102_v1 = vmul.f32 %v1673_v15, %v1100_v0 }
 0x735   :  { %v1105_v16 = vpack.c.bf16 %v1102_v1, %v1102_v1  ;;  %v1263_v17 = vrot.slane %v1102_v1, %v2113_v43  ;;  %v1300_v58 = vrot.slane %v1102_v1, %v2116_v35  ;;  %v1493_v1 = vld [vmem:[%s2446_s5] ss:$0 sm:$0xff] }
 0x737   :  { %1139 = vmatmul.mubr.bf16.vlgmr.msra.gmra.mrb[28].mxu0 %v1105_v16  ;;  %1180 = vmatmul.mubr.bf16.vlgmr.msra.gmra.mrb[28].mxu1 %v1105_v16  ;;  %v2357_v40 = vsel %vm1317_vm5, %v2278_v38, %v1263_v17  ;;  %v2360_v33 = vsel %vm1317_vm5, %v2281_v41, %v1300_v58  ;;  %v1559_v38 = vpack.c.bf16 %v1335_v51, %v1334_v50  ;;  %v1336_v41 = vld [vmem:[%s2445_s4 + $0x40] sm:$0xff] }
 0x738   :  { %1550 = vmatpush3.bf16.msra.mxu0 %v1547_v44  ;;  %v1563_v55 = vpack.c.bf16 %v1337_v54, %v1336_v41 }
 0x739   :  { %1552 = vmatprep.subr.bf16.mxu0 %v1551_v47 }
 0x73c   :  { %1554 = vmatpush3.bf16.msra.mxu0 %v1551_v47 }
 0x73d   :  { %1556 = vmatprep.subr.bf16.mxu0 %v1555_v49 }
 0x740   :  { %1558 = vmatpush3.bf16.msra.mxu0 %v1555_v49 }
 0x741   :  { %1560 = vmatprep.subr.bf16.mxu0 %v1559_v38 }
 0x744   :  { %1562 = vmatpush3.bf16.msra.mxu0 %v1559_v38 }
 0x745   :  { %1564 = vmatprep.subr.bf16.mxu0 %v1563_v55 }
 0x748   :  { %1566 = vmatpush3.bf16.msra.mxu0 %v1563_v55 }
 0x749   :  { %1568 = vmatprep.subr.bf16.mxu0 %v1567_v52 }
 0x74c   :  { %1570 = vmatpush3.bf16.msra.mxu0 %v1567_v52 }
 0x74d   :  { %1572 = vmatprep.subr.bf16.mxu0 %v1571_v60 }
 0x750   :  { %1574 = vmatpush3.bf16.msra.mxu0 %v1571_v60 }
 0x751   :  { %1576 = vmatprep.subr.bf16.mxu0 %v1575_v62 }
 0x754   :  { %1578 = vmatpush3.bf16.msra.mxu0 %v1575_v62 }
 0x80a   :  { %v1140_v63 = vpop.f32.mrb[28].mxu0  ;;  %v1181_v39 = vpop.f32.mrb[28].mxu1 }
 0x80b   :  { %v1142_v3 = vpop.f32.mrb[29].mxu0  ;;  %v1183_v4 = vpop.f32.mrb[29].mxu1 }
 0x80c   :  { %v1192_v18 = vcombine.low %v1140_v63, %v1142_v3  ;;  %v1193_v19 = vcombine.low %v1181_v39, %v1183_v4  ;;  %v1144_v20 = vpop.f32.mrb[30].mxu0  ;;  %v1185_v21 = vpop.f32.mrb[30].mxu1 }
 0x80d   :  { %v1145_v22 = vpop.f32.mrb[31].mxu0  ;;  %v1186_v23 = vpop.f32.mrb[31].mxu1 }
 0x80e   :  { %v1200_v24 = vrot.slane %v1192_v18, %v2005_v42  ;;  %v1207_v25 = vrot.slane %v1193_v19, %v2005_v42 }
 0x810   :  { %v1208_v27 = vcombine.low %v1200_v24, %v1207_v25 }
 0x812   :  { %v1210_v28 = vadd.f32 %v1492_v26, %v1208_v27 }
 0x814   :  { %v1211_v29 = vmul.f32 0.5, %v1210_v28  ;;  %v1216_v30 = vrot.slane %v1210_v28, 6 }
 0x816   :  { %1674 = vtanh.f32 %v1211_v29 }
 0x817   :  { %1676 = vtanh.f32 %v1216_v30 }
 0x820   :  { %v1675_v31 = vpop.eup %1674 }
 0x821   :  { %v1213_v32 = vmul.f32 0.5, %v1675_v31  ;;  %v1677_v7 = vpop.eup %1676 }
 0x823   :  { %v1214_v5 = vadd.f32 0.5, %v1213_v32 }
 0x825   :  { %v1220_v6 = vrot.slane %v1214_v5, 2  ;;  %v1223_v9 = vmul.f32 %v1677_v7, %v1214_v5  ;;  %v1226_v42 = vrot.slane %v1214_v5, 4 }
 0x827   :  { %v1222_v8 = vmul.f32 %v1220_v6, %v2351_v14 }
 0x829   :  { %v1224_v10 = vadd.f32 %v1223_v9, %v1222_v8 }
 0x82b   :  { %1678 = vtanh.f32 %v1224_v10  ;;  %1429 = vst [vmem:[%s2449_s8] sm:$0x3] %v1224_v10 }
 0x835   :  { %v1679_v11 = vpop.eup %1678 }
 0x836   :  { %v1228_v12 = vmul.f32 %v1679_v11, %v1226_v42 }
 0x838   :  { %v1269_v13 = vrot.slane %v1228_v12, %v2113_v43  ;;  %1428 = vst [vmem:[%s2448_s7] sm:$0x3] %v1228_v12  ;;  %v1305_v0 = vrot.slane %v1228_v12, %v2116_v35  ;;  %s1695_s7 = scalar_lea.vmem %s1436_s13, 256 }
 0x839   :  { %p1696_p0 = scmp.ne.s32.totalorder %s1436_s13, %s1695_s7  ;;  %p1701_p2 = scmp.lt.s32.totalorder %s1695_s7, %s1695_s7 }
 0x83a   :  { %v1320_v14 = vsel %vm1319_vm6, %v2357_v40, %v1269_v13  ;;  %v1327_v15 = vsel %vm1319_vm6, %v2360_v33, %v1305_v0 }
 0x83b   :  { %1544 = vmatprep.mubr.f32.mxu0 %v1320_v14  ;;  %p1702_p3 = por %p1701_p2, %p1700_p1 }
 0x83c   :  { %1545 = vmatmul.mubr.f32.vlgmr.msra.gmra.mrb[32].mxu0 %v1327_v15 }
 0x83d   :  { %p1703_p4 = pnand %p1702_p3, %p1696_p0 }
 0x90f   :  { %v1546_v16 = vpop.f32.mrb[32].mxu0 }
 0x910   :  { %v1423_v43 = vadd.f32 %v1546_v16, %v1493_v1  ;;  %v1417_v17 = vpop.f32.mrb[33].mxu0 }
 0x911   :  { %v1418_v58 = vadd.f32 %v1493_v1, %v1417_v17 }
 0x912   :  { %1427 = vst [vmem:[#allocation2 + $0x8] sm:$0xff] %v1423_v43 }
 0x913   :  { %1426 = vst [vmem:[#allocation2] sm:$0xff] %v1418_v58 }
 0x914   :  { %1706 = shalt.err (!%p1703_p4)
}
 0x915   :  { %s1707_s5 = scalar_lea.hbm %s2447_s6, 256 }
 0x916   :  { %p1708_p5 = scmp.ne.s32.totalorder %s2447_s6, %s1707_s5  ;;  %p1711_p6 = scmp.lt.u32.totalorder %s1707_s5, %s2447_s6 }
 0x918   :  { %p1713_p7 = pnand %p1711_p6, %p1708_p5 }
 0x91a   :  { %1716 = shalt.err (!%p1713_p7)
}
 0x91b   :  { %s1722_s20 = smov 128   ;;  %s1723_s21 = smov 8  }
 0x91c   :  { %1441 = dma.vmem_to_hbm [thread:$0]  %s1436_s13, 256, %s2447_s6, [#allocation3], %s1722_s20, %s1722_s20, %s1723_s21  }
 0x91d   :  { %1717 = dma.done.wait [#allocation3], 256  }
 0x91e   :  { %1718 = vsyncadd [#allocation3], 4294967040 }
 0x91f   :  { %1453 = vsyncpa [#allocation3], 1 }

</bundles_post_ra>
